<compile_context>
chip_gen: v5e
topology: v5e:2x2
jax: 0.10.0
libtpu: 0.0.40
codegen_flags: <defaults>
</compile_context>

<pallas_src>
import jax
import jax.numpy as jnp
from jax.experimental import pallas as pl
from jax.experimental.pallas import tpu as pltpu

H1, H2 = 800, 600  # hidden sizes from the PyTorch Actor


def _round_up(x, m):
    return ((x + m - 1) // m) * m


def actor_kernel(s_ref, w1_ref, b1_ref, w2_ref, b2_ref, w3_ref, b3_ref, out_ref):
    # layer_1 + ReLU   (bf16 operands, f32 MXU accumulation)
    h1 = jnp.dot(s_ref[...], w1_ref[...], preferred_element_type=jnp.float32)
    h1 = jnp.maximum(h1 + b1_ref[...], 0.0)
    # layer_2 + ReLU
    h2 = jnp.dot(h1.astype(jnp.bfloat16), w2_ref[...],
                 preferred_element_type=jnp.float32)
    h2 = jnp.maximum(h2 + b2_ref[...], 0.0)
    # layer_3 + tanh — tiny (H2_P x AD_P) GEMM, run in f32 for accuracy.
    a = jnp.dot(h2, w3_ref[...].astype(jnp.float32),
                preferred_element_type=jnp.float32)
    out_ref[...] = jnp.tanh(a + b3_ref[...]).astype(out_ref.dtype)


def actor_forward(s, params, *, action_dim, block_b=256, num_cores=1):
    """s: [B, state_dim] f32.  params: padded (bf16 weights [in,out], f32 biases).

    num_cores: set to 2 on v7x so the batch grid gets at least two tiles and
    both TensorCores are used (no effect when the batch is too small to split).
    """
    w1, b1, w2, b2, w3, b3 = params
    B, sd = s.shape
    SD_P, H1_P = w1.shape
    H2_P = w2.shape[1]
    AD_P = w3.shape[1]

    # --- Batch tiling: pad rows to a sublane multiple, then split into tiles
    # so padding never exceeds one sublane group (<= 7 wasted rows).
    Bs = _round_up(max(B, 1), 8)
    num_tiles = pl.cdiv(Bs, block_b)
    # Ensure at least `num_cores` tiles (>= 8 rows each) so megacore can split.
    num_tiles = max(num_tiles, min(num_cores, Bs // 8))
    num_tiles = max(num_tiles, 1)
    TB = _round_up(pl.cdiv(Bs, num_tiles), 8)
    B_P = TB * num_tiles
    grid = (num_tiles,)

    # Zero-pad + cast the state to bf16 in the wrapper (kernel consumed bf16
    # anyway, so this is bit-identical and halves the input stream).
    s_p = jnp.zeros((B_P, SD_P), jnp.bfloat16).at[:B, :sd].set(
        s.astype(jnp.bfloat16))

    # Weights/biases are resident: constant block index across the batch grid
    # means they are DMA'd into VMEM once and never re-fetched per tile.
    resident = lambda shape: pl.BlockSpec(shape, lambda i: (0,) * len(shape))

    flops = 2 * B_P * (SD_P * H1_P + H1_P * H2_P + H2_P * AD_P)
    bytes_accessed = (
        (w1.size + w2.size + w3.size) * 2          # bf16 weights
        + (b1.size + b2.size + b3.size) * 4        # f32 biases
        + B_P * SD_P * 2                           # bf16 state in
        + B_P * AD_P * 4                           # f32 actions out
    )
    cost = pl.CostEstimate(flops=flops, transcendentals=B_P * AD_P,
                           bytes_accessed=bytes_accessed)

    out_p = pl.pallas_call(
        actor_kernel,
        out_shape=jax.ShapeDtypeStruct((B_P, AD_P), jnp.float32),
        grid=grid,
        in_specs=[
            pl.BlockSpec((TB, SD_P), lambda i: (i, 0)),
            resident(w1.shape), resident(b1.shape),
            resident(w2.shape), resident(b2.shape),
            resident(w3.shape), resident(b3.shape),
        ],
        out_specs=pl.BlockSpec((TB, AD_P), lambda i: (i, 0)),
        compiler_params=pltpu.CompilerParams(
            dimension_semantics=("parallel",)),
        cost_estimate=cost,
    )(s_p, w1, b1, w2, b2, w3, b3)

    # Slice the real rows / action columns back out of the padded result.
    return out_p[:B, :action_dim]


def init_actor_params(key, state_dim, action_dim):
    """PyTorch nn.Linear-style init (uniform +-1/sqrt(fan_in)), then zero-pad
    every feature dim to a multiple of 128 and cast weights to bf16.
    Weights are stored as [in, out] (already transposed for the kernel)."""
    SD_P = _round_up(state_dim, 128)
    H1_P = _round_up(H1, 128)   # 896
    H2_P = _round_up(H2, 128)   # 640
    AD_P = _round_up(action_dim, 128)

    def linear(key, fan_in, fan_out, fan_in_p, fan_out_p):
        kw, kb = jax.random.split(key)
        bound = 1.0 / jnp.sqrt(float(fan_in))
        w = jax.random.uniform(kw, (fan_in, fan_out), jnp.float32, -bound, bound)
        b = jax.random.uniform(kb, (1, fan_out), jnp.float32, -bound, bound)
        w_p = jnp.zeros((fan_in_p, fan_out_p), jnp.float32).at[:fan_in, :fan_out].set(w)
        b_p = jnp.zeros((1, fan_out_p), jnp.float32).at[:, :fan_out].set(b)
        return w_p.astype(jnp.bfloat16), b_p

    k1, k2, k3 = jax.random.split(key, 3)
    w1, b1 = linear(k1, state_dim, H1, SD_P, H1_P)
    w2, b2 = linear(k2, H1, H2, H1_P, H2_P)
    w3, b3 = linear(k3, H2, action_dim, H2_P, AD_P)
    return (w1, b1, w2, b2, w3, b3)


def actor_reference(s, params, action_dim):
    """Pure-JAX f32 reference using the same (padded) parameters."""
    w1, b1, w2, b2, w3, b3 = params
    B, sd = s.shape
    SD_P = w1.shape[0]
    s_p = jnp.zeros((B, SD_P), jnp.float32).at[:, :sd].set(s)
    h = jnp.maximum(s_p @ w1.astype(jnp.float32) + b1, 0.0)
    h = jnp.maximum(h @ w2.astype(jnp.float32) + b2, 0.0)
    a = jnp.tanh(h @ w3.astype(jnp.float32) + b3)
    return a[:, :action_dim]


if __name__ == "__main__":
    key = jax.random.PRNGKey(0)
    k_params, k_state = jax.random.split(key)

    batch = 2
    state_dim = 24     # typical velodyne TD3 state (20 laser bins + 4)
    action_dim = 2

    params = init_actor_params(k_params, state_dim, action_dim)
    s = jax.random.normal(k_state, (batch, state_dim), jnp.float32)

    out = actor_forward(s, params, action_dim=action_dim)
    out = jax.block_until_ready(out)

    ref = actor_reference(s, params, action_dim)
    assert out.shape == (batch, action_dim), out.shape
    # bf16 weights / bf16 layer-1,2 activations vs f32 reference.
    assert jnp.allclose(out, ref, atol=3e-2, rtol=3e-2), (out, ref)

    print("KERNEL_OK")
</pallas_src>

<mosaic_0001>
module attributes {stable_mosaic.version = 11 : i64} {
  func.func @actor_kernel(%arg0: i32, %arg1: memref<8x128xbf16, #tpu.memory_space<vmem>>, %arg2: memref<128x896xbf16, #tpu.memory_space<vmem>>, %arg3: memref<1x896xf32, #tpu.memory_space<vmem>>, %arg4: memref<896x640xbf16, #tpu.memory_space<vmem>>, %arg5: memref<1x640xf32, #tpu.memory_space<vmem>>, %arg6: memref<640x128xbf16, #tpu.memory_space<vmem>>, %arg7: memref<1x128xf32, #tpu.memory_space<vmem>>, %arg8: memref<8x128xf32, #tpu.memory_space<vmem>>) attributes {dimension_semantics = [#tpu.dimension_semantics<parallel>], iteration_bounds = array<i64: 1>, scalar_prefetch = 0 : i64, scratch_operands = 0 : i64, tpu.core_type = #tpu.core_type<tc>, window_params = [{transform_indices = @transform_0, window_bounds = array<i64: 8, 128>}, {pipeline_mode = #tpu.pipeline_mode<synchronous>, transform_indices = @transform_1, window_bounds = array<i64: 128, 896>}, {pipeline_mode = #tpu.pipeline_mode<synchronous>, transform_indices = @transform_2, window_bounds = array<i64: 1, 896>}, {pipeline_mode = #tpu.pipeline_mode<synchronous>, transform_indices = @transform_3, window_bounds = array<i64: 896, 640>}, {pipeline_mode = #tpu.pipeline_mode<synchronous>, transform_indices = @transform_4, window_bounds = array<i64: 1, 640>}, {pipeline_mode = #tpu.pipeline_mode<synchronous>, transform_indices = @transform_5, window_bounds = array<i64: 640, 128>}, {pipeline_mode = #tpu.pipeline_mode<synchronous>, transform_indices = @transform_6, window_bounds = array<i64: 1, 128>}, {transform_indices = @transform_7, window_bounds = array<i64: 8, 128>}]} {
    %c0 = arith.constant 0 : index
    %c0_0 = arith.constant 0 : index
    %0 = vector.load %arg1[%c0, %c0_0] : memref<8x128xbf16, #tpu.memory_space<vmem>>, vector<8x128xbf16>
    %c0_1 = arith.constant 0 : index
    %c0_2 = arith.constant 0 : index
    %1 = vector.load %arg2[%c0_1, %c0_2] : memref<128x896xbf16, #tpu.memory_space<vmem>>, vector<128x896xbf16>
    %cst = arith.constant dense<0.000000e+00> : vector<8x896xf32>
    %2 = tpu.matmul %0, %1, %cst {dimension_numbers = #tpu.dot_dimension_numbers<[1], [0], [0], [1], [0, 0, 1, 1], [], []>} : vector<8x128xbf16>, vector<128x896xbf16>, vector<8x896xf32> -> vector<8x896xf32>
    %c0_3 = arith.constant 0 : index
    %c0_4 = arith.constant 0 : index
    %3 = vector.load %arg3[%c0_3, %c0_4] : memref<1x896xf32, #tpu.memory_space<vmem>>, vector<1x896xf32>
    %4 = vector.broadcast %3 : vector<1x896xf32> to vector<8x896xf32>
    %5 = arith.addf %2, %4 : vector<8x896xf32>
    %cst_5 = arith.constant 0.000000e+00 : f32
    %6 = vector.broadcast %cst_5 : f32 to vector<8x896xf32>
    %7 = arith.maximumf %5, %6 : vector<8x896xf32>
    %8 = arith.truncf %7 : vector<8x896xf32> to vector<8x896xbf16>
    %c0_6 = arith.constant 0 : index
    %c0_7 = arith.constant 0 : index
    %9 = vector.load %arg4[%c0_6, %c0_7] : memref<896x640xbf16, #tpu.memory_space<vmem>>, vector<896x640xbf16>
    %cst_8 = arith.constant dense<0.000000e+00> : vector<8x640xf32>
    %10 = tpu.matmul %8, %9, %cst_8 {dimension_numbers = #tpu.dot_dimension_numbers<[1], [0], [0], [1], [0, 0, 1, 1], [], []>} : vector<8x896xbf16>, vector<896x640xbf16>, vector<8x640xf32> -> vector<8x640xf32>
    %c0_9 = arith.constant 0 : index
    %c0_10 = arith.constant 0 : index
    %11 = vector.load %arg5[%c0_9, %c0_10] : memref<1x640xf32, #tpu.memory_space<vmem>>, vector<1x640xf32>
    %12 = vector.broadcast %11 : vector<1x640xf32> to vector<8x640xf32>
    %13 = arith.addf %10, %12 : vector<8x640xf32>
    %cst_11 = arith.constant 0.000000e+00 : f32
    %14 = vector.broadcast %cst_11 : f32 to vector<8x640xf32>
    %15 = arith.maximumf %13, %14 : vector<8x640xf32>
    %c0_12 = arith.constant 0 : index
    %c0_13 = arith.constant 0 : index
    %16 = vector.load %arg6[%c0_12, %c0_13] : memref<640x128xbf16, #tpu.memory_space<vmem>>, vector<640x128xbf16>
    %17 = arith.extf %16 : vector<640x128xbf16> to vector<640x128xf32>
    %cst_14 = arith.constant dense<0.000000e+00> : vector<8x128xf32>
    %18 = tpu.matmul %15, %17, %cst_14 {dimension_numbers = #tpu.dot_dimension_numbers<[1], [0], [0], [1], [0, 0, 1, 1], [], []>} : vector<8x640xf32>, vector<640x128xf32>, vector<8x128xf32> -> vector<8x128xf32>
    %c0_15 = arith.constant 0 : index
    %c0_16 = arith.constant 0 : index
    %19 = vector.load %arg7[%c0_15, %c0_16] : memref<1x128xf32, #tpu.memory_space<vmem>>, vector<1x128xf32>
    %20 = vector.broadcast %19 : vector<1x128xf32> to vector<8x128xf32>
    %21 = arith.addf %18, %20 : vector<8x128xf32>
    %22 = math.tanh %21 : vector<8x128xf32>
    %c0_17 = arith.constant 0 : index
    %c0_18 = arith.constant 0 : index
    %23 = vector.load %arg8[%c0_17, %c0_18] : memref<8x128xf32, #tpu.memory_space<vmem>>, vector<8x128xf32>
    tpu.vector_store %arg8[%c0_17, %c0_18], %22 {strides = array<i32>} : memref<8x128xf32, #tpu.memory_space<vmem>>, vector<8x128xf32>,
    return
  }
  func.func @transform_0(%arg0: i32) -> (i32, i32) {
    %c0_i32 = arith.constant 0 : i32
    %c0_i32_0 = arith.constant 0 : i32
    return %arg0, %c0_i32 : i32, i32
  }
  func.func @transform_1(%arg0: i32) -> (i32, i32) {
    %c0_i32 = arith.constant 0 : i32
    %c0_i32_0 = arith.constant 0 : i32
    %c0_i32_1 = arith.constant 0 : i32
    return %c0_i32, %c0_i32_0 : i32, i32
  }
  func.func @transform_2(%arg0: i32) -> (i32, i32) {
    %c0_i32 = arith.constant 0 : i32
    %c0_i32_0 = arith.constant 0 : i32
    %c0_i32_1 = arith.constant 0 : i32
    return %c0_i32, %c0_i32_0 : i32, i32
  }
  func.func @transform_3(%arg0: i32) -> (i32, i32) {
    %c0_i32 = arith.constant 0 : i32
    %c0_i32_0 = arith.constant 0 : i32
    %c0_i32_1 = arith.constant 0 : i32
    return %c0_i32, %c0_i32_0 : i32, i32
  }
  func.func @transform_4(%arg0: i32) -> (i32, i32) {
    %c0_i32 = arith.constant 0 : i32
    %c0_i32_0 = arith.constant 0 : i32
    %c0_i32_1 = arith.constant 0 : i32
    return %c0_i32, %c0_i32_0 : i32, i32
  }
  func.func @transform_5(%arg0: i32) -> (i32, i32) {
    %c0_i32 = arith.constant 0 : i32
    %c0_i32_0 = arith.constant 0 : i32
    %c0_i32_1 = arith.constant 0 : i32
    return %c0_i32, %c0_i32_0 : i32, i32
  }
  func.func @transform_6(%arg0: i32) -> (i32, i32) {
    %c0_i32 = arith.constant 0 : i32
    %c0_i32_0 = arith.constant 0 : i32
    %c0_i32_1 = arith.constant 0 : i32
    return %c0_i32, %c0_i32_0 : i32, i32
  }
  func.func @transform_7(%arg0: i32) -> (i32, i32) {
    %c0_i32 = arith.constant 0 : i32
    %c0_i32_0 = arith.constant 0 : i32
    return %arg0, %c0_i32 : i32, i32
  }
}

</mosaic_0001>

<bundles_post_ra>
// kernel: tpu_custom_call.1
= control target key start
LH: loop header
LB: loop body
LE: loop exit
PB: predicated region body
PF: predicated region fallthrough
CT: control target
= control target key end

     0   :  { %12 = vsyncpa [#allocation3], 0  ;;  %s5453_s0 = inlined_call_operand.hbm [shape: bf16[8,128], index: 0, kind: input, shape index: {}]   ;;  %s5454_s1 = inlined_call_operand.hbm [shape: bf16[128,896], index: 1, kind: input, shape index: {}]   ;;  %s5455_s2 = inlined_call_operand.hbm [shape: f32[1,896], index: 2, kind: input, shape index: {}]   ;;  %s5456_s3 = inlined_call_operand.hbm [shape: bf16[896,640], index: 3, kind: input, shape index: {}]   ;;  %s5457_s4 = inlined_call_operand.hbm [shape: f32[1,640], index: 4, kind: input, shape index: {}]   ;;  %s5458_s5 = inlined_call_operand.hbm [shape: bf16[640,128], index: 5, kind: input, shape index: {}]   ;;  %s5459_s6 = inlined_call_operand.hbm [shape: f32[1,128], index: 6, kind: input, shape index: {}]   ;;  %s5460_s7 = inlined_call_operand.hbm [shape: f32[8,128], index: 7, kind: output, shape index: {}]  }
   0x1   :  { %13 = vsyncpa [#allocation6], 0 }
   0x2   :  { %14 = vsyncpa [#allocation9], 0 }
   0x3   :  { %15 = vsyncpa [#allocation12], 0  ;;  %s32_s26 = sshll.u32 %s5454_s1, 4  ;;  %s33_s26 = int_to_ptr.hbm [resolvable:$true] %s32_s26 }
   0x4   :  { %16 = vsyncpa [#allocation4], 0  ;;  %s5251_s27 = smov [#allocation5]   ;;  %s56_s8 = sshll.u32 %s5456_s3, 4  ;;  %s57_s8 = int_to_ptr.hbm [resolvable:$true] %s56_s8 }
   0x5   :  { %s34_s28 = sshll.u32 %s5251_s27, 4  ;;  %s5252_s9 = smov 448   ;;  %s35_s28 = int_to_ptr.vmem [resolvable:$true] %s34_s28 }
   0x6   :  { %s5253_s10 = smov 28   ;;  %s5254_s11 = smov [#allocation8]  }
   0x7   :  { %40 = dma.hbm_to_vmem [thread:$0]  %s33_s26, 7168, %s35_s28, [#allocation6], %s5252_s9, %s5252_s9, %s5253_s10  }
   0x8   :  { %s58_s12 = sshll.u32 %s5254_s11, 4  ;;  %s5255_s13 = smov 320   ;;  %s59_s12 = int_to_ptr.vmem [resolvable:$true] %s58_s12 }
   0x9   :  { %s5256_s14 = smov 20   ;;  %s80_s16 = sshll.u32 %s5458_s5, 4  ;;  %s81_s16 = int_to_ptr.hbm [resolvable:$true] %s80_s16 }
   0xa   :  { %64 = dma.hbm_to_vmem [thread:$0]  %s57_s8, 35840, %s59_s12, [#allocation9], %s5255_s13, %s5255_s13, %s5256_s14  }
   0xb   :  { %s5257_s17 = smov [#allocation11]   ;;  %s22_s20 = sshll.u32 %s5453_s0, 4  ;;  %s23_s20 = int_to_ptr.hbm [resolvable:$true] %s22_s20 }
   0xc   :  { %s82_s18 = sshll.u32 %s5257_s17, 4  ;;  %s5258_s21 = smov 64   ;;  %s83_s18 = int_to_ptr.vmem [resolvable:$true] %s82_s18 }
   0xd   :  { %s5259_s22 = smov 4   ;;  %s5260_s23 = smov [#allocation2]  }
   0xe   :  { %88 = dma.hbm_to_vmem [thread:$0]  %s81_s16, 5120, %s83_s18, [#allocation12], %s5258_s21, %s5258_s21, %s5259_s22  }
   0xf   :  { %s24_s24 = sshll.u32 %s5260_s23, 4  ;;  %s46_s27 = sshll.u32 %s5455_s2, 4  ;;  %s25_s24 = int_to_ptr.vmem [resolvable:$true] %s24_s24  ;;  %s47_s27 = int_to_ptr.hbm [resolvable:$true] %s46_s27 }
  0x10   :  { %27 = dma.hbm_to_vmem [thread:$0]  %s23_s20, 64, %s25_s24, [#allocation3]  }
  0x11   :  { %s70_s29 = sshll.u32 %s5457_s4, 4  ;;  %s5261_s30 = smov [#allocation7]   ;;  %s71_s29 = int_to_ptr.hbm [resolvable:$true] %s70_s29 }
  0x12   :  { %s48_s8 = sshll.u32 %s5261_s30, 4  ;;  %s5262_s0 = smov [#allocation10]   ;;  %s49_s8 = int_to_ptr.vmem [resolvable:$true] %s48_s8 }
  0x13   :  { %51 = dma.hbm_to_vmem [thread:$0]  %s47_s27, 112, %s49_s8, [#allocation6]  }
  0x14   :  { %s72_s9 = sshll.u32 %s5262_s0, 4  ;;  %s94_s12 = sshll.u32 %s5459_s6, 4  ;;  %s73_s9 = int_to_ptr.vmem [resolvable:$true] %s72_s9  ;;  %s95_s12 = int_to_ptr.hbm [resolvable:$true] %s94_s12 }
  0x15   :  { %75 = dma.hbm_to_vmem [thread:$0]  %s71_s29, 80, %s73_s9, [#allocation9]  }
  0x16   :  { %s5263_s2 = smov [#allocation13]  }
  0x17   :  { %s96_s13 = sshll.u32 %s5263_s2, 4  ;;  %s97_s13 = int_to_ptr.vmem [resolvable:$true] %s96_s13 }
  0x18   :  { %99 = dma.hbm_to_vmem [thread:$0]  %s95_s12, 16, %s97_s13, [#allocation12]  }
  0x19   :  { %5241 = dma.done.wait [#allocation3], 64  }
  0x1a   :  { %5242 = vsyncadd [#allocation3], 4294967232 }
  0x1b   :  { %5243 = dma.done.wait [#allocation6], 7280  }
  0x1c   :  { %5244 = vsyncadd [#allocation6], 4294960016 }
  0x1d   :  { %5245 = dma.done.wait [#allocation9], 35920  }
  0x1e   :  { %5246 = vsyncadd [#allocation9], 4294931376 }
  0x1f   :  { %5247 = dma.done.wait [#allocation12], 5136  }
  0x20   :  { %5248 = vsyncadd [#allocation12], 4294962160  ;;  %v3350_v0 = vld [vmem:[#allocation5 + $0x188] sm:$0xf]  ;;  %v4548_v1 = vld [vmem:[#allocation5 + $0x1a0] sm:$0xf0] }
  0x21   :  { %v4545_v2 = vld [vmem:[#allocation5 + $0x18c] sm:$0xf]  ;;  %v3351_v3 = vor.u32 %v4548_v1, %v3350_v0  ;;  %v3352_v4 = vld [vmem:[#allocation5 + $0x1a4] sm:$0xf0]  ;;  %v3358_v5 = vld [vmem:[#allocation5 + $0x190] sm:$0xf] }
  0x22   :  { %v4549_v6 = vld [vmem:[#allocation5 + $0x1a8] sm:$0xf0]  ;;  %v3355_v7 = vor.u32 %v4545_v2, %v3352_v4  ;;  %v4546_v9 = vld [vmem:[#allocation5 + $0x194] sm:$0xf]  ;;  %v3360_v10 = vld [vmem:[#allocation5 + $0x1ac] sm:$0xf0] }
  0x23   :  { %v3359_v8 = vor.u32 %v4549_v6, %v3358_v5  ;;  %v3322_v11 = vld [vmem:[#allocation5 + $0x150] sm:$0xf]  ;;  %497 = vmatpush.bf16.msra.mxu0 %v3351_v3  ;;  %v3363_v12 = vor.u32 %v4546_v9, %v3360_v10  ;;  %v4541_v13 = vld [vmem:[#allocation5 + $0x168] sm:$0xf0]  ;;  %v4538_v14 = vld [vmem:[#allocation5 + $0x154] sm:$0xf] }
  0x24   :  { %v3324_v15 = vld [vmem:[#allocation5 + $0x16c] sm:$0xf0]  ;;  %510 = vmatpush.bf16.msra.mxu1 %v3355_v7  ;;  %v3323_v16 = vor.u32 %v4541_v13, %v3322_v11  ;;  %v3330_v18 = vld [vmem:[#allocation5 + $0x158] sm:$0xf]  ;;  %v4542_v19 = vld [vmem:[#allocation5 + $0x170] sm:$0xf0] }
  0x25   :  { %523 = vmatpush.bf16.msra.mxu2 %v3359_v8  ;;  %v3327_v17 = vor.u32 %v4538_v14, %v3324_v15  ;;  %v4539_v20 = vld [vmem:[#allocation5 + $0x15c] sm:$0xf]  ;;  %536 = vmatpush.bf16.msra.mxu3 %v3363_v12  ;;  %v3331_v21 = vor.u32 %v4542_v19, %v3330_v18  ;;  %v3332_v22 = vld [vmem:[#allocation5 + $0x174] sm:$0xf0]  ;;  %v4534_v24 = vld [vmem:[#allocation5 + $0x130] sm:$0xf0] }
  0x26   :  { %v3294_v23 = vld [vmem:[#allocation5 + $0x118] sm:$0xf]  ;;  %v3335_v25 = vor.u32 %v4539_v20, %v3332_v22  ;;  %v4531_v26 = vld [vmem:[#allocation5 + $0x11c] sm:$0xf]  ;;  %v3302_v28 = vld [vmem:[#allocation5 + $0x120] sm:$0xf] }
  0x27   :  { %v3296_v27 = vld [vmem:[#allocation5 + $0x134] sm:$0xf0]  ;;  %498 = vmatpush.bf16.msra.mxu0 %v3323_v16  ;;  %v3295_v29 = vor.u32 %v4534_v24, %v3294_v23  ;;  %v4535_v30 = vld [vmem:[#allocation5 + $0x138] sm:$0xf0]  ;;  %v4532_v31 = vld [vmem:[#allocation5 + $0x124] sm:$0xf] }
  0x28   :  { %v3304_v32 = vld [vmem:[#allocation5 + $0x13c] sm:$0xf0]  ;;  %511 = vmatpush.bf16.msra.mxu1 %v3327_v17  ;;  %v3299_v33 = vor.u32 %v4531_v26, %v3296_v27  ;;  %v3303_v34 = vor.u32 %v4535_v30, %v3302_v28  ;;  %v4527_v36 = vld [vmem:[#allocation5 + $0xf8] sm:$0xf0]  ;;  %v4524_v37 = vld [vmem:[#allocation5 + $0xe4] sm:$0xf] }
  0x29   :  { %524 = vmatpush.bf16.msra.mxu2 %v3331_v21  ;;  %v3266_v35 = vld [vmem:[#allocation5 + $0xe0] sm:$0xf]  ;;  %537 = vmatpush.bf16.msra.mxu3 %v3335_v25  ;;  %v3307_v38 = vor.u32 %v4532_v31, %v3304_v32  ;;  %v3274_v40 = vld [vmem:[#allocation5 + $0xe8] sm:$0xf]  ;;  %v4528_v41 = vld [vmem:[#allocation5 + $0x100] sm:$0xf0] }
  0x2a   :  { %v3268_v39 = vld [vmem:[#allocation5 + $0xfc] sm:$0xf0]  ;;  %v4525_v42 = vld [vmem:[#allocation5 + $0xec] sm:$0xf]  ;;  %v3276_v43 = vld [vmem:[#allocation5 + $0x104] sm:$0xf0]  ;;  %v3267_v44 = vor.u32 %v4527_v36, %v3266_v35  ;;  %v3275_v46 = vor.u32 %v4528_v41, %v3274_v40 }
  0x2b   :  { %499 = vmatpush.bf16.msra.mxu0 %v3295_v29  ;;  %v3271_v45 = vor.u32 %v4524_v37, %v3268_v39  ;;  %v3238_v47 = vld [vmem:[#allocation5 + $0xa8] sm:$0xf]  ;;  %v4520_v48 = vld [vmem:[#allocation5 + $0xc0] sm:$0xf0]  ;;  %v4517_v49 = vld [vmem:[#allocation5 + $0xac] sm:$0xf]  ;;  %v3279_v50 = vor.u32 %v4525_v42, %v3276_v43 }
  0x2c   :  { %512 = vmatpush.bf16.msra.mxu1 %v3299_v33  ;;  %v3240_v51 = vld [vmem:[#allocation5 + $0xc4] sm:$0xf0]  ;;  %v3246_v52 = vld [vmem:[#allocation5 + $0xb0] sm:$0xf]  ;;  %v4521_v53 = vld [vmem:[#allocation5 + $0xc8] sm:$0xf0]  ;;  %v3239_v56 = vor.u32 %v4520_v48, %v3238_v47 }
  0x2d   :  { %525 = vmatpush.bf16.msra.mxu2 %v3303_v34  ;;  %538 = vmatpush.bf16.msra.mxu3 %v3307_v38  ;;  %v4518_v54 = vld [vmem:[#allocation5 + $0xb4] sm:$0xf]  ;;  %v3248_v55 = vld [vmem:[#allocation5 + $0xcc] sm:$0xf0]  ;;  %v3243_v57 = vor.u32 %v4517_v49, %v3240_v51  ;;  %v3247_v58 = vor.u32 %v4521_v53, %v3246_v52  ;;  %v4513_v60 = vld [vmem:[#allocation5 + $0x88] sm:$0xf0] }
  0x2e   :  { %v3210_v59 = vld [vmem:[#allocation5 + $0x70] sm:$0xf]  ;;  %v4510_v61 = vld [vmem:[#allocation5 + $0x74] sm:$0xf]  ;;  %v3251_v62 = vor.u32 %v4518_v54, %v3248_v55  ;;  %v3218_v0 = vld [vmem:[#allocation5 + $0x78] sm:$0xf] }
  0x2f   :  { %500 = vmatpush.bf16.msra.mxu0 %v3267_v44  ;;  %v3212_v63 = vld [vmem:[#allocation5 + $0x8c] sm:$0xf0]  ;;  %v4514_v1 = vld [vmem:[#allocation5 + $0x90] sm:$0xf0]  ;;  %v4511_v2 = vld [vmem:[#allocation5 + $0x7c] sm:$0xf]  ;;  %v3211_v4 = vor.u32 %v4513_v60, %v3210_v59 }
  0x30   :  { %513 = vmatpush.bf16.msra.mxu1 %v3271_v45  ;;  %v3220_v3 = vld [vmem:[#allocation5 + $0x94] sm:$0xf0]  ;;  %v3215_v5 = vor.u32 %v4510_v61, %v3212_v63  ;;  %v3219_v6 = vor.u32 %v4514_v1, %v3218_v0  ;;  %v4506_v8 = vld [vmem:[#allocation5 + $0x50] sm:$0xf0]  ;;  %v4503_v9 = vld [vmem:[#allocation5 + $0x3c] sm:$0xf] }
  0x31   :  { %526 = vmatpush.bf16.msra.mxu2 %v3275_v46  ;;  %539 = vmatpush.bf16.msra.mxu3 %v3279_v50  ;;  %v3182_v7 = vld [vmem:[#allocation5 + $0x38] sm:$0xf]  ;;  %v3223_v10 = vor.u32 %v4511_v2, %v3220_v3  ;;  %v3190_v12 = vld [vmem:[#allocation5 + $0x40] sm:$0xf]  ;;  %v4507_v13 = vld [vmem:[#allocation5 + $0x58] sm:$0xf0] }
  0x32   :  { %v3184_v11 = vld [vmem:[#allocation5 + $0x54] sm:$0xf0]  ;;  %v4504_v14 = vld [vmem:[#allocation5 + $0x44] sm:$0xf]  ;;  %v3192_v15 = vld [vmem:[#allocation5 + $0x5c] sm:$0xf0]  ;;  %v3183_v16 = vor.u32 %v4506_v8, %v3182_v7  ;;  %v3191_v20 = vor.u32 %v4507_v13, %v3190_v12 }
  0x33   :  { %501 = vmatpush.bf16.msra.mxu0 %v3239_v56  ;;  %v3154_v17 = vld [vmem:[#allocation5] sm:$0xf]  ;;  %v4499_v18 = vld [vmem:[#allocation5 + $0x18] sm:$0xf0]  ;;  %v3187_v19 = vor.u32 %v4503_v9, %v3184_v11  ;;  %v4496_v21 = vld [vmem:[#allocation5 + $0x4] sm:$0xf]  ;;  %v3195_v24 = vor.u32 %v4504_v14, %v3192_v15 }
  0x34   :  { %514 = vmatpush.bf16.msra.mxu1 %v3243_v57  ;;  %v3156_v22 = vld [vmem:[#allocation5 + $0x1c] sm:$0xf0]  ;;  %v3162_v23 = vld [vmem:[#allocation5 + $0x8] sm:$0xf]  ;;  %v4500_v25 = vld [vmem:[#allocation5 + $0x20] sm:$0xf0]  ;;  %v3155_v31 = vor.u32 %v4499_v18, %v3154_v17 }
  0x35   :  { %527 = vmatpush.bf16.msra.mxu2 %v3247_v58  ;;  %540 = vmatpush.bf16.msra.mxu3 %v3251_v62  ;;  %v4497_v26 = vld [vmem:[#allocation5 + $0xc] sm:$0xf]  ;;  %v3164_v27 = vld [vmem:[#allocation5 + $0x24] sm:$0xf0]  ;;  %v3366_v28 = vld [vmem:[#allocation5 + $0x198] sm:$0xf]  ;;  %v3159_v35 = vor.u32 %v4496_v21, %v3156_v22  ;;  %v3163_v36 = vor.u32 %v4500_v25, %v3162_v23 }
  0x36   :  { %v4550_v29 = vld [vmem:[#allocation5 + $0x1b0] sm:$0xf0]  ;;  %v4547_v30 = vld [vmem:[#allocation5 + $0x19c] sm:$0xf]  ;;  %v3368_v32 = vld [vmem:[#allocation5 + $0x1b4] sm:$0xf0]  ;;  %v3167_v37 = vor.u32 %v4497_v26, %v3164_v27 }
  0x37   :  { %502 = vmatpush.bf16.msra.mxu0 %v3211_v4  ;;  %v3374_v33 = vld [vmem:[#allocation5 + $0x1a0] sm:$0xf]  ;;  %v4551_v34 = vld [vmem:[#allocation5 + $0x1b8] sm:$0xf0]  ;;  %v3367_v38 = vor.u32 %v4550_v29, %v3366_v28  ;;  %v3371_v39 = vor.u32 %v4547_v30, %v3368_v32  ;;  %v4540_v43 = vld [vmem:[#allocation5 + $0x164] sm:$0xf] }
  0x38   :  { %515 = vmatpush.bf16.msra.mxu1 %v3215_v5  ;;  %v3375_v40 = vor.u32 %v4551_v34, %v3374_v33  ;;  %v3338_v41 = vld [vmem:[#allocation5 + $0x160] sm:$0xf]  ;;  %v4543_v42 = vld [vmem:[#allocation5 + $0x178] sm:$0xf0]  ;;  %v3346_v45 = vld [vmem:[#allocation5 + $0x168] sm:$0xf] }
  0x39   :  { %528 = vmatpush.bf16.msra.mxu2 %v3219_v6  ;;  %541 = vmatpush.bf16.msra.mxu3 %v3223_v10  ;;  %v3340_v44 = vld [vmem:[#allocation5 + $0x17c] sm:$0xf0]  ;;  %v4544_v46 = vld [vmem:[#allocation5 + $0x180] sm:$0xf0]  ;;  %v5326_v47 = vld [vmem:[#allocation2] sm:$0xf]  ;;  %v3339_v48 = vor.u32 %v4543_v42, %v3338_v41 }
  0x3a   :  { %v3343_v49 = vor.u32 %v4540_v43, %v3340_v44  ;;  %v3347_v50 = vor.u32 %v4544_v46, %v3346_v45  ;;  %v3310_v51 = vld [vmem:[#allocation5 + $0x128] sm:$0xf]  ;;  %v4536_v52 = vld [vmem:[#allocation5 + $0x140] sm:$0xf0]  ;;  %v4533_v53 = vld [vmem:[#allocation5 + $0x12c] sm:$0xf] }
  0x3b   :  { %503 = vmatpush.bf16.msra.mxu0 %v3183_v16  ;;  %v3312_v54 = vld [vmem:[#allocation5 + $0x144] sm:$0xf0]  ;;  %v3318_v55 = vld [vmem:[#allocation5 + $0x130] sm:$0xf]  ;;  %v4537_v56 = vld [vmem:[#allocation5 + $0x148] sm:$0xf0]  ;;  %v3311_v58 = vor.u32 %v4536_v52, %v3310_v51 }
  0x3c   :  { %516 = vmatpush.bf16.msra.mxu1 %v3187_v19  ;;  %v3282_v57 = vld [vmem:[#allocation5 + $0xf0] sm:$0xf]  ;;  %v4529_v59 = vld [vmem:[#allocation5 + $0x108] sm:$0xf0]  ;;  %v4526_v60 = vld [vmem:[#allocation5 + $0xf4] sm:$0xf]  ;;  %v3315_v62 = vor.u32 %v4533_v53, %v3312_v54  ;;  %v3319_v63 = vor.u32 %v4537_v56, %v3318_v55 }
  0x3d   :  { %529 = vmatpush.bf16.msra.mxu2 %v3191_v20  ;;  %542 = vmatpush.bf16.msra.mxu3 %v3195_v24  ;;  %v3518_v61 = vld [vmem:[#allocation8 + $0x118] sm:$0xf]  ;;  %v3284_v0 = vld [vmem:[#allocation5 + $0x10c] sm:$0xf0]  ;;  %v3290_v1 = vld [vmem:[#allocation5 + $0xf8] sm:$0xf]  ;;  %v3283_v7 = vor.u32 %v4529_v59, %v3282_v57 }
  0x3e   :  { %v4589_v2 = vld [vmem:[#allocation8 + $0x128] sm:$0xf0]  ;;  %v3498_v5 = vld [vmem:[#allocation8 + $0xf0] sm:$0xf]  ;;  %v4584_v6 = vld [vmem:[#allocation8 + $0x100] sm:$0xf0]  ;;  %v3287_v11 = vor.u32 %v4526_v60, %v3284_v0 }
  0x3f   :  { %504 = vmatpush.bf16.msra.mxu0 %v3155_v31  ;;  %v4530_v3 = vld [vmem:[#allocation5 + $0x110] sm:$0xf0]  ;;  %v3519_v4 = vor.u32 %v4589_v2, %v3518_v61  ;;  %v3254_v8 = vld [vmem:[#allocation5 + $0xb8] sm:$0xf]  ;;  %v3499_v10 = vor.u32 %v4584_v6, %v3498_v5  ;;  %v4519_v13 = vld [vmem:[#allocation5 + $0xbc] sm:$0xf] }
  0x40   :  { %517 = vmatpush.bf16.msra.mxu1 %v3159_v35  ;;  %v4522_v9 = vld [vmem:[#allocation5 + $0xd0] sm:$0xf0]  ;;  %v3291_v12 = vor.u32 %v4530_v3, %v3290_v1  ;;  %v3478_v14 = vld [vmem:[#allocation8 + $0xc8] sm:$0xf]  ;;  %v4579_v15 = vld [vmem:[#allocation8 + $0xd8] sm:$0xf0] }
  0x41   :  { %530 = vmatpush.bf16.msra.mxu2 %v3163_v36  ;;  %543 = vmatpush.bf16.msra.mxu3 %v3167_v37  ;;  %v3256_v16 = vld [vmem:[#allocation5 + $0xd4] sm:$0xf0]  ;;  %v3262_v17 = vld [vmem:[#allocation5 + $0xc0] sm:$0xf]  ;;  %v4523_v18 = vld [vmem:[#allocation5 + $0xd8] sm:$0xf0]  ;;  %v3255_v19 = vor.u32 %v4522_v9, %v3254_v8  ;;  %v3479_v22 = vor.u32 %v4579_v15, %v3478_v14 }
  0x42   :  { %505 = vmatmul.bf16.vlgmr.msra.gmra.mxu0 %v5326_v47  ;;  %v3226_v20 = vld [vmem:[#allocation5 + $0x80] sm:$0xf]  ;;  %v4515_v21 = vld [vmem:[#allocation5 + $0x98] sm:$0xf0]  ;;  %v3259_v23 = vor.u32 %v4519_v13, %v3256_v16  ;;  %v3263_v24 = vor.u32 %v4523_v18, %v3262_v17  ;;  %v4512_v25 = vld [vmem:[#allocation5 + $0x84] sm:$0xf] }
  0x43   :  { %549 = vmatpush.bf16.msrb.mxu0 %v3367_v38  ;;  %518 = vmatmul.bf16.vlgmr.msra.gmra.mxu1 %v5326_v47  ;;  %v3458_v26 = vld [vmem:[#allocation8 + $0xa0] sm:$0xf]  ;;  %v4574_v27 = vld [vmem:[#allocation8 + $0xb0] sm:$0xf0]  ;;  %v3228_v28 = vld [vmem:[#allocation5 + $0x9c] sm:$0xf0]  ;;  %v3227_v31 = vor.u32 %v4515_v21, %v3226_v20 }
  0x44   :  { %562 = vmatpush.bf16.msrb.mxu1 %v3371_v39  ;;  %531 = vmatmul.bf16.vlgmr.msra.gmra.mxu2 %v5326_v47  ;;  %v3234_v29 = vld [vmem:[#allocation5 + $0x88] sm:$0xf]  ;;  %v4516_v30 = vld [vmem:[#allocation5 + $0xa0] sm:$0xf0]  ;;  %v3459_v34 = vor.u32 %v4574_v27, %v3458_v26  ;;  %v3231_v35 = vor.u32 %v4512_v25, %v3228_v28  ;;  %v4505_v37 = vld [vmem:[#allocation5 + $0x4c] sm:$0xf] }
  0x45   :  { %575 = vmatpush.bf16.msrb.mxu2 %v3375_v40  ;;  %544 = vmatmul.bf16.vlgmr.msra.gmra.mxu3 %v5326_v47  ;;  %v3198_v32 = vld [vmem:[#allocation5 + $0x48] sm:$0xf]  ;;  %v4508_v33 = vld [vmem:[#allocation5 + $0x60] sm:$0xf0]  ;;  %v3235_v36 = vor.u32 %v4516_v30, %v3234_v29  ;;  %v3438_v38 = vld [vmem:[#allocation8 + $0x78] sm:$0xf] }
  0x46   :  { %2406 = vmatpush.bf16.msrb.mxu3 %v3519_v4  ;;  %v4569_v39 = vld [vmem:[#allocation8 + $0x88] sm:$0xf0]  ;;  %v3200_v40 = vld [vmem:[#allocation5 + $0x64] sm:$0xf0]  ;;  %v3206_v41 = vld [vmem:[#allocation5 + $0x50] sm:$0xf]  ;;  %v3199_v44 = vor.u32 %v4508_v33, %v3198_v32 }
  0x47   :  { %550 = vmatpush.bf16.msrb.mxu0 %v3339_v48  ;;  %v4509_v42 = vld [vmem:[#allocation5 + $0x68] sm:$0xf0]  ;;  %v3170_v43 = vld [vmem:[#allocation5 + $0x10] sm:$0xf]  ;;  %v4498_v46 = vld [vmem:[#allocation5 + $0x14] sm:$0xf]  ;;  %v3439_v48 = vor.u32 %v4569_v39, %v3438_v38 }
  0x48   :  { %563 = vmatpush.bf16.msrb.mxu1 %v3343_v49  ;;  %v4501_v45 = vld [vmem:[#allocation5 + $0x28] sm:$0xf0]  ;;  %v3203_v49 = vor.u32 %v4505_v37, %v3200_v40  ;;  %v3172_v51 = vld [vmem:[#allocation5 + $0x2c] sm:$0xf0]  ;;  %v3418_v52 = vld [vmem:[#allocation8 + $0x50] sm:$0xf] }
  0x49   :  { %576 = vmatpush.bf16.msrb.mxu2 %v3347_v50  ;;  %v3207_v50 = vor.u32 %v4509_v42, %v3206_v41  ;;  %v4564_v53 = vld [vmem:[#allocation8 + $0x60] sm:$0xf0]  ;;  %v3178_v54 = vld [vmem:[#allocation5 + $0x18] sm:$0xf]  ;;  %v4502_v55 = vld [vmem:[#allocation5 + $0x30] sm:$0xf0]  ;;  %v3171_v60 = vor.u32 %v4501_v45, %v3170_v43  ;;  %v3175_v0 = vor.u32 %v4498_v46, %v3172_v51 }
  0x4a   :  { %2407 = vmatpush.bf16.msrb.mxu3 %v3499_v10  ;;  %v3678_v56 = vld [vmem:[#allocation8 + $0x258] sm:$0xf]  ;;  %v4629_v57 = vld [vmem:[#allocation8 + $0x268] sm:$0xf0]  ;;  %v3179_v1 = vor.u32 %v4502_v55, %v3178_v54  ;;  %v3658_v3 = vld [vmem:[#allocation8 + $0x230] sm:$0xf] }
  0x4b   :  { %551 = vmatpush.bf16.msrb.mxu0 %v3311_v58  ;;  %v3838_v58 = vld [vmem:[#allocation8 + $0x398] sm:$0xf]  ;;  %v4669_v59 = vld [vmem:[#allocation8 + $0x3a8] sm:$0xf0]  ;;  %v3679_v2 = vor.u32 %v4629_v57, %v3678_v56  ;;  %v3398_v5 = vld [vmem:[#allocation8 + $0x28] sm:$0xf] }
  0x4c   :  { %564 = vmatpush.bf16.msrb.mxu1 %v3315_v62  ;;  %v3998_v61 = vld [vmem:[#allocation8 + $0x4d8] sm:$0xf]  ;;  %v4709_v62 = vld [vmem:[#allocation8 + $0x4e8] sm:$0xf0]  ;;  %v3839_v4 = vor.u32 %v4669_v59, %v3838_v58  ;;  %v4559_v6 = vld [vmem:[#allocation8 + $0x38] sm:$0xf0] }
  0x4d   :  { %577 = vmatpush.bf16.msrb.mxu2 %v3319_v63  ;;  %v3419_v63 = vor.u32 %v4564_v53, %v3418_v52  ;;  %v3999_v8 = vor.u32 %v4709_v62, %v3998_v61  ;;  %v3818_v9 = vld [vmem:[#allocation8 + $0x370] sm:$0xf]  ;;  %v4664_v10 = vld [vmem:[#allocation8 + $0x380] sm:$0xf0]  ;;  %v3638_v13 = vld [vmem:[#allocation8 + $0x208] sm:$0xf]  ;;  %v3399_v14 = vor.u32 %v4559_v6, %v3398_v5 }
  0x4e   :  { %2408 = vmatpush.bf16.msrb.mxu3 %v3479_v22  ;;  %v4619_v16 = vld [vmem:[#allocation8 + $0x218] sm:$0xf0]  ;;  %v3819_v17 = vor.u32 %v4664_v10, %v3818_v9  ;;  %v3378_v18 = vld [vmem:[#allocation8] sm:$0xf]  ;;  %v3798_v21 = vld [vmem:[#allocation8 + $0x348] sm:$0xf] }
  0x4f   :  { %552 = vmatpush.bf16.msrb.mxu0 %v3283_v7  ;;  %v4624_v7 = vld [vmem:[#allocation8 + $0x240] sm:$0xf0]  ;;  %v4659_v22 = vld [vmem:[#allocation8 + $0x358] sm:$0xf0]  ;;  %v4158_v25 = vld [vmem:[#allocation8 + $0x618] sm:$0xf]  ;;  %v3639_v28 = vor.u32 %v4619_v16, %v3638_v13 }
  0x50   :  { %565 = vmatpush.bf16.msrb.mxu1 %v3287_v11  ;;  %v3978_v11 = vld [vmem:[#allocation8 + $0x4b0] sm:$0xf]  ;;  %v3659_v15 = vor.u32 %v4624_v7, %v3658_v3  ;;  %v4749_v26 = vld [vmem:[#allocation8 + $0x628] sm:$0xf0]  ;;  %v3618_v29 = vld [vmem:[#allocation8 + $0x1e0] sm:$0xf] }
  0x51   :  { %578 = vmatpush.bf16.msrb.mxu2 %v3291_v12  ;;  %v4704_v12 = vld [vmem:[#allocation8 + $0x4c0] sm:$0xf0]  ;;  %v4614_v30 = vld [vmem:[#allocation8 + $0x1f0] sm:$0xf0]  ;;  %v3778_v33 = vld [vmem:[#allocation8 + $0x320] sm:$0xf] }
  0x52   :  { %2409 = vmatpush.bf16.msrb.mxu3 %v3459_v34  ;;  %v3979_v20 = vor.u32 %v4704_v12, %v3978_v11  ;;  %v4654_v34 = vld [vmem:[#allocation8 + $0x330] sm:$0xf0]  ;;  %v4138_v38 = vld [vmem:[#allocation8 + $0x5f0] sm:$0xf]  ;;  %v3619_v39 = vor.u32 %v4614_v30, %v3618_v29  ;;  %v3598_v40 = vld [vmem:[#allocation8 + $0x1b8] sm:$0xf] }
  0x53   :  { %553 = vmatpush.bf16.msrb.mxu0 %v3255_v19  ;;  %v4554_v19 = vld [vmem:[#allocation8 + $0x10] sm:$0xf0]  ;;  %v4609_v41 = vld [vmem:[#allocation8 + $0x1c8] sm:$0xf0]  ;;  %v3779_v42 = vor.u32 %v4654_v34, %v3778_v33  ;;  %v3918_v46 = vld [vmem:[#allocation8 + $0x438] sm:$0xf] }
  0x54   :  { %566 = vmatpush.bf16.msrb.mxu1 %v3259_v23  ;;  %v3958_v23 = vld [vmem:[#allocation8 + $0x488] sm:$0xf]  ;;  %v3379_v27 = vor.u32 %v4554_v19, %v3378_v18  ;;  %v4694_v37 = vld [vmem:[#allocation8 + $0x470] sm:$0xf0]  ;;  %v4649_v45 = vld [vmem:[#allocation8 + $0x308] sm:$0xf0]  ;;  %v3599_v52 = vor.u32 %v4609_v41, %v3598_v40 }
  0x55   :  { %579 = vmatpush.bf16.msrb.mxu2 %v3263_v24  ;;  %v4699_v24 = vld [vmem:[#allocation8 + $0x498] sm:$0xf0]  ;;  %v3578_v53 = vld [vmem:[#allocation8 + $0x190] sm:$0xf]  ;;  %v4604_v54 = vld [vmem:[#allocation8 + $0x1a0] sm:$0xf0] }
  0x56   :  { %2410 = vmatpush.bf16.msrb.mxu3 %v3439_v48  ;;  %v3959_v32 = vor.u32 %v4699_v24, %v3958_v23  ;;  %v4739_v51 = vld [vmem:[#allocation8 + $0x5d8] sm:$0xf0]  ;;  %v3738_v57 = vld [vmem:[#allocation8 + $0x2d0] sm:$0xf]  ;;  %v4644_v58 = vld [vmem:[#allocation8 + $0x2e0] sm:$0xf0] }
  0x57   :  { %554 = vmatpush.bf16.msrb.mxu0 %v3227_v31  ;;  %v3799_v31 = vor.u32 %v4659_v22, %v3798_v21  ;;  %v3898_v59 = vld [vmem:[#allocation8 + $0x410] sm:$0xf]  ;;  %v4684_v61 = vld [vmem:[#allocation8 + $0x420] sm:$0xf0]  ;;  %v4098_v62 = vld [vmem:[#allocation8 + $0x5a0] sm:$0xf]  ;;  %v3739_v3 = vor.u32 %v4644_v58, %v3738_v57 }
  0x58   :  { %567 = vmatpush.bf16.msrb.mxu1 %v3231_v35  ;;  %v3938_v35 = vld [vmem:[#allocation8 + $0x460] sm:$0xf]  ;;  %v3718_v5 = vld [vmem:[#allocation8 + $0x2a8] sm:$0xf]  ;;  %v4639_v6 = vld [vmem:[#allocation8 + $0x2b8] sm:$0xf0] }
  0x59   :  { %580 = vmatpush.bf16.msrb.mxu2 %v3235_v36  ;;  %v4159_v36 = vor.u32 %v4749_v26, %v4158_v25  ;;  %v3939_v43 = vor.u32 %v4694_v37, %v3938_v35  ;;  %v3878_v7 = vld [vmem:[#allocation8 + $0x3e8] sm:$0xf]  ;;  %v4679_v9 = vld [vmem:[#allocation8 + $0x3f8] sm:$0xf0]  ;;  %v4078_v10 = vld [vmem:[#allocation8 + $0x578] sm:$0xf]  ;;  %v3719_v16 = vor.u32 %v4639_v6, %v3718_v5 }
  0x5a   :  { %2411 = vmatpush.bf16.msrb.mxu3 %v3419_v63  ;;  %v4734_v63 = vld [vmem:[#allocation8 + $0x5b0] sm:$0xf0]  ;;  %v4729_v11 = vld [vmem:[#allocation8 + $0x588] sm:$0xf0]  ;;  %v3538_v13 = vld [vmem:[#allocation8 + $0x140] sm:$0xf]  ;;  %v3879_v18 = vor.u32 %v4679_v9, %v3878_v7 }
  0x5b   :  { %555 = vmatpush.bf16.msrb.mxu0 %v3199_v44  ;;  %v3758_v44 = vld [vmem:[#allocation8 + $0x2f8] sm:$0xf]  ;;  %v3698_v19 = vld [vmem:[#allocation8 + $0x280] sm:$0xf]  ;;  %v4079_v21 = vor.u32 %v4729_v11, %v4078_v10  ;;  %v4674_v23 = vld [vmem:[#allocation8 + $0x3d0] sm:$0xf0] }
  0x5c   :  { %568 = vmatpush.bf16.msrb.mxu1 %v3203_v49  ;;  %v4689_v49 = vld [vmem:[#allocation8 + $0x448] sm:$0xf0]  ;;  %v3759_v55 = vor.u32 %v4649_v45, %v3758_v44  ;;  %v3858_v22 = vld [vmem:[#allocation8 + $0x3c0] sm:$0xf]  ;;  %v4478_v24 = vld [vmem:[#allocation8 + $0x898] sm:$0xf] }
  0x5d   :  { %581 = vmatpush.bf16.msrb.mxu2 %v3207_v50  ;;  %v4118_v50 = vld [vmem:[#allocation8 + $0x5c8] sm:$0xf]  ;;  %v3919_v56 = vor.u32 %v4689_v49, %v3918_v46  ;;  %v4829_v25 = vld [vmem:[#allocation8 + $0x8a8] sm:$0xf0]  ;;  %v4587_v26 = vld [vmem:[#allocation8 + $0x11c] sm:$0xf]  ;;  %v3859_v33 = vor.u32 %v4674_v23, %v3858_v22 }
  0x5e   :  { %2412 = vmatpush.bf16.msrb.mxu3 %v3399_v14  ;;  %v4594_v14 = vld [vmem:[#allocation8 + $0x150] sm:$0xf0]  ;;  %v4058_v30 = vld [vmem:[#allocation8 + $0x550] sm:$0xf]  ;;  %v4784_v35 = vld [vmem:[#allocation8 + $0x740] sm:$0xf0] }
  0x5f   :  { %556 = vmatpush.bf16.msrb.mxu0 %v3171_v60  ;;  %v4119_v60 = vor.u32 %v4739_v51, %v4118_v50  ;;  %v4298_v34 = vld [vmem:[#allocation8 + $0x730] sm:$0xf]  ;;  %v3500_v40 = vld [vmem:[#allocation8 + $0x104] sm:$0xf0]  ;;  %v4779_v44 = vld [vmem:[#allocation8 + $0x718] sm:$0xf0] }
  0x60   :  { %569 = vmatpush.bf16.msrb.mxu1 %v3175_v0  ;;  %v3579_v0 = vor.u32 %v4604_v54, %v3578_v53  ;;  %v4819_v49 = vld [vmem:[#allocation8 + $0x858] sm:$0xf0]  ;;  %v4577_v50 = vld [vmem:[#allocation8 + $0xcc] sm:$0xf]  ;;  %v3480_v51 = vld [vmem:[#allocation8 + $0xdc] sm:$0xf0] }
  0x61   :  { %582 = vmatpush.bf16.msrb.mxu2 %v3179_v1  ;;  %v3558_v1 = vld [vmem:[#allocation8 + $0x168] sm:$0xf]  ;;  %v4258_v53 = vld [vmem:[#allocation8 + $0x6e0] sm:$0xf]  ;;  %v4774_v54 = vld [vmem:[#allocation8 + $0x6f0] sm:$0xf0] }
  0x62   :  { %557 = vmatmul.bf16.vlgmr.msrb.gmra.mxu0 %v5326_v47  ;;  %2413 = vmatpush.bf16.msrb.mxu3 %v3379_v27  ;;  %v3520_v27 = vld [vmem:[#allocation8 + $0x12c] sm:$0xf0]  ;;  %v4418_v57 = vld [vmem:[#allocation8 + $0x820] sm:$0xf]  ;;  %v4814_v58 = vld [vmem:[#allocation8 + $0x830] sm:$0xf0] }
  0x63   :  { %2419 = vmatpush.bf16.msra.mxu0 %v3679_v2  ;;  %570 = vmatmul.bf16.vlgmr.msrb.gmra.mxu1 %v5326_v47  ;;  %v4599_v2 = vld [vmem:[#allocation8 + $0x178] sm:$0xf0]  ;;  %v3523_v37 = vor.u32 %v4587_v26, %v3520_v27  ;;  %v4398_v6 = vld [vmem:[#allocation8 + $0x7f8] sm:$0xf]  ;;  %v4809_v7 = vld [vmem:[#allocation8 + $0x808] sm:$0xf0] }
  0x64   :  { %2432 = vmatpush.bf16.msra.mxu1 %v3839_v4  ;;  %583 = vmatmul.bf16.vlgmr.msrb.gmra.mxu2 %v5326_v47  ;;  %v4744_v47 = vld [vmem:[#allocation8 + $0x600] sm:$0xf0]  ;;  %v3899_v4 = vor.u32 %v4684_v61, %v3898_v59  ;;  %v3559_v12 = vor.u32 %v4599_v2, %v3558_v1  ;;  %v4259_v61 = vor.u32 %v4774_v54, %v4258_v53  ;;  %v3440_v10 = vld [vmem:[#allocation8 + $0x8c] sm:$0xf0]  ;;  %v3420_v22 = vld [vmem:[#allocation8 + $0x64] sm:$0xf0] }
  0x65   :  { %2445 = vmatpush.bf16.msra.mxu2 %v3999_v8  ;;  %v4139_v48 = vor.u32 %v4744_v47, %v4138_v38  ;;  %v4099_v8 = vor.u32 %v4734_v63, %v4098_v62  ;;  %v4458_v38 = vld [vmem:[#allocation8 + $0x870] sm:$0xf]  ;;  %v4824_v47 = vld [vmem:[#allocation8 + $0x880] sm:$0xf0]  ;;  %v4238_v62 = vld [vmem:[#allocation8 + $0x6b8] sm:$0xf]  ;;  %v4399_v9 = vor.u32 %v4809_v7, %v4398_v6 }
  0x66   :  { %2458 = vmatpush.bf16.msra.mxu3 %v4159_v36  ;;  %v4479_v36 = vor.u32 %v4829_v25, %v4478_v24  ;;  %v4459_v45 = vor.u32 %v4824_v47, %v4458_v38  ;;  %v4572_v59 = vld [vmem:[#allocation8 + $0xa4] sm:$0xf]  ;;  %v4769_v63 = vld [vmem:[#allocation8 + $0x6c8] sm:$0xf0]  ;;  %v4018_v24 = vld [vmem:[#allocation8 + $0x500] sm:$0xf] }
  0x67   :  { %2420 = vmatpush.bf16.msra.mxu0 %v3659_v15  ;;  %v4318_v15 = vld [vmem:[#allocation8 + $0x758] sm:$0xf]  ;;  %v4239_v2 = vor.u32 %v4769_v63, %v4238_v62  ;;  %v4714_v25 = vld [vmem:[#allocation8 + $0x510] sm:$0xf0]  ;;  %v4178_v26 = vld [vmem:[#allocation8 + $0x640] sm:$0xf] }
  0x68   :  { %2433 = vmatpush.bf16.msra.mxu1 %v3819_v17  ;;  %v4789_v17 = vld [vmem:[#allocation8 + $0x768] sm:$0xf0]  ;;  %v4019_v27 = vor.u32 %v4714_v25, %v4018_v24  ;;  %v4552_v47 = vld [vmem:[#allocation8 + $0x4] sm:$0xf]  ;;  %v4662_v63 = vld [vmem:[#allocation8 + $0x374] sm:$0xf] }
  0x69   :  { %2446 = vmatpush.bf16.msra.mxu2 %v3979_v20  ;;  %v4634_v20 = vld [vmem:[#allocation8 + $0x290] sm:$0xf0]  ;;  %v4747_v6 = vld [vmem:[#allocation8 + $0x61c] sm:$0xf]  ;;  %s5264_s4 = smov [#allocation14]   ;;  %s3139_s15 = sshll.u32 %s5460_s7, 4  ;;  %s3140_s15 = int_to_ptr.hbm [resolvable:$true] %s3139_s15 }
  0x6a   :  { %2459 = vmatpush.bf16.msra.mxu3 %v4139_v48  ;;  %v3699_v29 = vor.u32 %v4634_v20, %v3698_v19  ;;  %v4438_v48 = vld [vmem:[#allocation8 + $0x848] sm:$0xf]  ;;  %v4804_v19 = vld [vmem:[#allocation8 + $0x7e0] sm:$0xf0]  ;;  %v4562_v20 = vld [vmem:[#allocation8 + $0x54] sm:$0xf] }
  0x6b   :  { %2421 = vmatpush.bf16.msra.mxu0 %v3639_v28  ;;  %v3539_v28 = vor.u32 %v4594_v14, %v3538_v13  ;;  %v4719_v13 = vld [vmem:[#allocation8 + $0x538] sm:$0xf0]  ;;  %v3423_v23 = vor.u32 %v4562_v20, %v3420_v22  ;;  %v4702_v22 = vld [vmem:[#allocation8 + $0x4b4] sm:$0xf]  ;;  %s3137_s6 = sshll.u32 %s5264_s4, 4  ;;  %s3138_s6 = int_to_ptr.vmem [resolvable:$true] %s3137_s6 }
  0x6c   :  { %2434 = vmatpush.bf16.msra.mxu1 %v3799_v31  ;;  %v4724_v31 = vld [vmem:[#allocation8 + $0x560] sm:$0xf0] }
  0x6d   :  { %2447 = vmatpush.bf16.msra.mxu2 %v3959_v32  ;;  %v4319_v32 = vor.u32 %v4789_v17, %v4318_v15  ;;  %v4059_v41 = vor.u32 %v4724_v31, %v4058_v30  ;;  %v4198_v15 = vld [vmem:[#allocation8 + $0x668] sm:$0xf]  ;;  %v4799_v31 = vld [vmem:[#allocation8 + $0x7b8] sm:$0xf0] }
  0x6e   :  { %2460 = vmatpush.bf16.msra.mxu3 %v4119_v60  ;;  %v3460_v60 = vld [vmem:[#allocation8 + $0xb4] sm:$0xf0]  ;;  %v4358_v30 = vld [vmem:[#allocation8 + $0x7a8] sm:$0xf] }
  0x6f   :  { %2422 = vmatpush.bf16.msra.mxu0 %v3619_v39  ;;  %v4582_v39 = vld [vmem:[#allocation8 + $0xf4] sm:$0xf]  ;;  %v3463_v1 = vor.u32 %v4572_v59, %v3460_v60  ;;  %v3660_v60 = vld [vmem:[#allocation8 + $0x244] sm:$0xf0] }
  0x70   :  { %2435 = vmatpush.bf16.msra.mxu1 %v3779_v42  ;;  %v4299_v42 = vor.u32 %v4784_v35, %v4298_v34  ;;  %v3503_v46 = vor.u32 %v4582_v39, %v3500_v40  ;;  %v3400_v34 = vld [vmem:[#allocation8 + $0x3c] sm:$0xf0]  ;;  %v3380_v39 = vld [vmem:[#allocation8 + $0x14] sm:$0xf0]  ;;  %v4622_v59 = vld [vmem:[#allocation8 + $0x234] sm:$0xf] }
  0x71   :  { %2448 = vmatpush.bf16.msra.mxu2 %v3939_v43  ;;  %v4278_v43 = vld [vmem:[#allocation8 + $0x708] sm:$0xf]  ;;  %v3383_v40 = vor.u32 %v4552_v47, %v3380_v39 }
  0x72   :  { %2461 = vmatpush.bf16.msra.mxu3 %v4099_v8  ;;  %v4567_v8 = vld [vmem:[#allocation8 + $0x7c] sm:$0xf] }
  0x73   :  { %2423 = vmatpush.bf16.msra.mxu0 %v3599_v52  ;;  %v4279_v52 = vor.u32 %v4779_v44, %v4278_v43  ;;  %v3443_v11 = vor.u32 %v4567_v8, %v3440_v10 }
  0x74   :  { %2436 = vmatpush.bf16.msra.mxu1 %v3759_v55  ;;  %v4439_v55 = vor.u32 %v4819_v49, %v4438_v48 }
  0x75   :  { %2449 = vmatpush.bf16.msra.mxu2 %v3919_v56  ;;  %v3483_v56 = vor.u32 %v4577_v50, %v3480_v51  ;;  %v3680_v50 = vld [vmem:[#allocation8 + $0x26c] sm:$0xf0]  ;;  %v4667_v51 = vld [vmem:[#allocation8 + $0x39c] sm:$0xf] }
  0x76   :  { %2462 = vmatpush.bf16.msra.mxu3 %v4079_v21 }
  0x77   :  { %2424 = vmatpush.bf16.msra.mxu0 %v3579_v0  ;;  %v4419_v0 = vor.u32 %v4814_v58, %v4418_v57 }
  0x78   :  { %2437 = vmatpush.bf16.msra.mxu1 %v3739_v3  ;;  %v4218_v3 = vld [vmem:[#allocation8 + $0x690] sm:$0xf] }
  0x79   :  { %2450 = vmatpush.bf16.msra.mxu2 %v3899_v4  ;;  %v4764_v4 = vld [vmem:[#allocation8 + $0x6a0] sm:$0xf0] }
  0x7a   :  { %2463 = vmatpush.bf16.msra.mxu3 %v4059_v41  ;;  %v4219_v5 = vor.u32 %v4764_v4, %v4218_v3  ;;  %v5335_v41 = vld [vmem:[#allocation7] sm:$0xff]  ;;  %v3663_v3 = vor.u32 %v4622_v59, %v3660_v60  ;;  %v3740_v59 = vld [vmem:[#allocation8 + $0x2e4] sm:$0xf0] }
  0x7b   :  { %2425 = vmatpush.bf16.msra.mxu0 %v3559_v12  ;;  %v4038_v12 = vld [vmem:[#allocation8 + $0x528] sm:$0xf]  ;;  %v196_v43 = vperm.slane %v5335_v41, 1  ;;  %v4707_v4 = vld [vmem:[#allocation8 + $0x4dc] sm:$0xf] }
  0x7c   :  { %2438 = vmatpush.bf16.msra.mxu1 %v3719_v16  ;;  %v4039_v14 = vor.u32 %v4719_v13, %v4038_v12  ;;  %v4759_v16 = vld [vmem:[#allocation8 + $0x678] sm:$0xf0]  ;;  %v4160_v12 = vld [vmem:[#allocation8 + $0x62c] sm:$0xf0]  ;;  %v4617_v13 = vld [vmem:[#allocation8 + $0x20c] sm:$0xf] }
  0x7d   :  { %2451 = vmatpush.bf16.msra.mxu2 %v3879_v18  ;;  %v4199_v17 = vor.u32 %v4759_v16, %v4198_v15  ;;  %v4378_v18 = vld [vmem:[#allocation8 + $0x7d0] sm:$0xf]  ;;  %v4657_v15 = vld [vmem:[#allocation8 + $0x34c] sm:$0xf]  ;;  %v3800_v16 = vld [vmem:[#allocation8 + $0x35c] sm:$0xf0]  ;;  %v4163_v20 = vor.u32 %v4747_v6, %v4160_v12 }
  0x7e   :  { %2464 = vmatpush.bf16.msra.mxu3 %v4039_v14  ;;  %v4379_v21 = vor.u32 %v4804_v19, %v4378_v18  ;;  %v3640_v14 = vld [vmem:[#allocation8 + $0x21c] sm:$0xf0]  ;;  %v4597_v6 = vld [vmem:[#allocation8 + $0x16c] sm:$0xf] }
  0x7f   :  { %2426 = vmatpush.bf16.msra.mxu0 %v3539_v28  ;;  %v4754_v28 = vld [vmem:[#allocation8 + $0x650] sm:$0xf0] }
  0x80   :  { %2439 = vmatpush.bf16.msra.mxu1 %v3699_v29  ;;  %v4179_v29 = vor.u32 %v4754_v28, %v4178_v26  ;;  %v3803_v26 = vor.u32 %v4657_v15, %v3800_v16  ;;  %v4140_v28 = vld [vmem:[#allocation8 + $0x604] sm:$0xf0] }
  0x81   :  { %2452 = vmatpush.bf16.msra.mxu2 %v3859_v33  ;;  %v4557_v33 = vld [vmem:[#allocation8 + $0x2c] sm:$0xf]  ;;  %v3900_v15 = vld [vmem:[#allocation8 + $0x424] sm:$0xf0] }
  0x82   :  { %2465 = vmatpush.bf16.msra.mxu3 %v4019_v27  ;;  %v3403_v35 = vor.u32 %v4557_v33, %v3400_v34  ;;  %v4742_v27 = vld [vmem:[#allocation8 + $0x5f4] sm:$0xf] }
  0x83   :  { %2471 = vmatpush.bf16.msrb.mxu0 %v4319_v32  ;;  %v4359_v32 = vor.u32 %v4799_v31, %v4358_v30  ;;  %v3620_v30 = vld [vmem:[#allocation8 + $0x1f4] sm:$0xf0]  ;;  %v4652_v31 = vld [vmem:[#allocation8 + $0x324] sm:$0xf] }
  0x84   :  { %2484 = vmatpush.bf16.msrb.mxu1 %v4479_v36  ;;  %v4338_v36 = vld [vmem:[#allocation8 + $0x780] sm:$0xf] }
  0x85   :  { %2497 = vmatpush.bf16.msrb.mxu2 %v3523_v37  ;;  %v4794_v37 = vld [vmem:[#allocation8 + $0x790] sm:$0xf0] }
  0x86   :  { %v4339_v38 = vor.u32 %v4794_v37, %v4338_v36  ;;  %v4697_v36 = vld [vmem:[#allocation8 + $0x48c] sm:$0xf]  ;;  %v3960_v37 = vld [vmem:[#allocation8 + $0x49c] sm:$0xf0] }
  0x87   :  { %2472 = vmatpush.bf16.msrb.mxu0 %v4299_v42  ;;  %v195_v42 = vperm.slane %v5335_v41, 0 }
  0x88   :  { %2485 = vmatpush.bf16.msrb.mxu1 %v4459_v45 }
  0x89   :  { %2498 = vmatpush.bf16.msrb.mxu2 %v3503_v46  ;;  %v4627_v46 = vld [vmem:[#allocation8 + $0x25c] sm:$0xf] }
  0x8a   :  { %v3683_v57 = vor.u32 %v4627_v46, %v3680_v50  ;;  %v3760_v46 = vld [vmem:[#allocation8 + $0x30c] sm:$0xf0]  ;;  %v4692_v50 = vld [vmem:[#allocation8 + $0x464] sm:$0xf] }
  0x8b   :  { %2473 = vmatpush.bf16.msrb.mxu0 %v4279_v52  ;;  %v3840_v52 = vld [vmem:[#allocation8 + $0x3ac] sm:$0xf0] }
  0x8c   :  { %2486 = vmatpush.bf16.msrb.mxu1 %v4439_v55  ;;  %v197_v55 = vperm.slane %v5335_v41, 2  ;;  %v3843_v58 = vor.u32 %v4667_v51, %v3840_v52  ;;  %v3940_v51 = vld [vmem:[#allocation8 + $0x474] sm:$0xf0] }
  0x8d   :  { %2499 = vmatpush.bf16.msrb.mxu2 %v3483_v56  ;;  %v198_v56 = vperm.slane %v5335_v41, 3  ;;  %v3943_v60 = vor.u32 %v4692_v50, %v3940_v51  ;;  %v4300_v50 = vld [vmem:[#allocation8 + $0x744] sm:$0xf0] }
  0x8f   :  { %2474 = vmatpush.bf16.msrb.mxu0 %v4259_v61 }
  0x90   :  { %2487 = vmatpush.bf16.msrb.mxu1 %v4419_v0  ;;  %v3820_v0 = vld [vmem:[#allocation8 + $0x384] sm:$0xf0] }
  0x91   :  { %2500 = vmatpush.bf16.msrb.mxu2 %v3463_v1 }
  0x93   :  { %2475 = vmatpush.bf16.msrb.mxu0 %v4239_v2 }
  0x94   :  { %2488 = vmatpush.bf16.msrb.mxu1 %v4399_v9 }
  0x95   :  { %2501 = vmatpush.bf16.msrb.mxu2 %v3443_v11  ;;  %v3823_v11 = vor.u32 %v4662_v63, %v3820_v0  ;;  %v4687_v0 = vld [vmem:[#allocation8 + $0x43c] sm:$0xf] }
  0x97   :  { %2476 = vmatpush.bf16.msrb.mxu0 %v4219_v5  ;;  %v4000_v5 = vld [vmem:[#allocation8 + $0x4ec] sm:$0xf0] }
  0x98   :  { %2489 = vmatpush.bf16.msrb.mxu1 %v4379_v21  ;;  %v4003_v19 = vor.u32 %v4707_v4, %v4000_v5  ;;  %v3643_v21 = vor.u32 %v4617_v13, %v3640_v14  ;;  %v4727_v4 = vld [vmem:[#allocation8 + $0x57c] sm:$0xf]  ;;  %v4080_v5 = vld [vmem:[#allocation8 + $0x58c] sm:$0xf0]  ;;  %v4682_v14 = vld [vmem:[#allocation8 + $0x414] sm:$0xf] }
  0x99   :  { %2502 = vmatpush.bf16.msrb.mxu2 %v3423_v23  ;;  %v3980_v23 = vld [vmem:[#allocation8 + $0x4c4] sm:$0xf0]  ;;  %v4083_v13 = vor.u32 %v4727_v4, %v4080_v5 }
  0x9a   :  { %v3983_v34 = vor.u32 %v4702_v22, %v3980_v23  ;;  %v3540_v22 = vld [vmem:[#allocation8 + $0x154] sm:$0xf0]  ;;  %v4632_v23 = vld [vmem:[#allocation8 + $0x284] sm:$0xf] }
  0x9b   :  { %2477 = vmatpush.bf16.msrb.mxu0 %v4199_v17 }
  0x9c   :  { %2490 = vmatpush.bf16.msrb.mxu1 %v4359_v32  ;;  %v3780_v32 = vld [vmem:[#allocation8 + $0x334] sm:$0xf0] }
  0x9d   :  { %2503 = vmatpush.bf16.msrb.mxu2 %v3403_v35  ;;  %v4143_v35 = vor.u32 %v4742_v27, %v4140_v28  ;;  %v3783_v39 = vor.u32 %v4652_v31, %v3780_v32  ;;  %v4827_v31 = vld [vmem:[#allocation8 + $0x89c] sm:$0xf] }
  0x9f   :  { %2478 = vmatpush.bf16.msrb.mxu0 %v4179_v29  ;;  %v4612_v29 = vld [vmem:[#allocation8 + $0x1e4] sm:$0xf] }
  0xa0   :  { %2491 = vmatpush.bf16.msrb.mxu1 %v4339_v38  ;;  %v3623_v47 = vor.u32 %v4612_v29, %v3620_v30  ;;  %v4787_v29 = vld [vmem:[#allocation8 + $0x75c] sm:$0xf]  ;;  %v4320_v30 = vld [vmem:[#allocation8 + $0x76c] sm:$0xf0] }
  0xa1   :  { %2504 = vmatpush.bf16.msrb.mxu2 %v3383_v40  ;;  %v4737_v40 = vld [vmem:[#allocation8 + $0x5cc] sm:$0xf] }
  0xbf   :  { %v506_v44 = vpop.f32.mrf.mxu0 }
  0xc0   :  { %v519_v45 = vpop.f32.mrf.mxu1  ;;  %v507_v48 = vadd.f32 %v506_v44, %v195_v42  ;;  %v4120_v42 = vld [vmem:[#allocation8 + $0x5dc] sm:$0xf0]  ;;  %v3600_v44 = vld [vmem:[#allocation8 + $0x1cc] sm:$0xf0] }
  0xc1   :  { %v520_v49 = vadd.f32 %v519_v45, %v196_v43  ;;  %v4607_v43 = vld [vmem:[#allocation8 + $0x1bc] sm:$0xf] }
  0xc2   :  { %v588_v53 = vmax.f32 %v507_v48, 0.0  ;;  %v4647_v45 = vld [vmem:[#allocation8 + $0x2fc] sm:$0xf]  ;;  %v3963_v48 = vor.u32 %v4697_v36, %v3960_v37  ;;  %v3603_v52 = vor.u32 %v4607_v43, %v3600_v44  ;;  %v4677_v36 = vld [vmem:[#allocation8 + $0x3ec] sm:$0xf]  ;;  %v201_v44 = vperm.slane %v5335_v41, 6 }
  0xc3   :  { %v589_v54 = vmax.f32 %v520_v49, 0.0  ;;  %v4123_v49 = vor.u32 %v4737_v40, %v4120_v42  ;;  %v3880_v37 = vld [vmem:[#allocation8 + $0x3fc] sm:$0xf0]  ;;  %v4717_v40 = vld [vmem:[#allocation8 + $0x52c] sm:$0xf] }
  0xc4   :  { %v5341_v61 = vpack.c.bf16 %v588_v53, %v588_v53  ;;  %v3763_v53 = vor.u32 %v4647_v45, %v3760_v46  ;;  %v4040_v42 = vld [vmem:[#allocation8 + $0x53c] sm:$0xf0]  ;;  %v4323_v46 = vor.u32 %v4787_v29, %v4320_v30 }
  0xc5   :  { %v5343_v62 = vpack.c.bf16 %v589_v54, %v589_v54  ;;  %v4732_v54 = vld [vmem:[#allocation8 + $0x5a4] sm:$0xf] }
  0xc6   :  { %2414 = vmatmul.bf16.vlgmr.msrb.gmra.mxu3 %v5341_v61 }
  0xc7   :  { %v532_v1 = vpop.f32.mrf.mxu2  ;;  %2427 = vmatmul.bf16.vlgmr.msra.gmra.mxu0 %v5343_v62  ;;  %2510 = vmatpush.bf16.msrb.mxu3 %v3683_v57  ;;  %v508_v9 = vpop.f32.mrf.mxu0  ;;  %v3580_v57 = vld [vmem:[#allocation8 + $0x1a4] sm:$0xf0] }
  0xc8   :  { %v545_v2 = vpop.f32.mrf.mxu3  ;;  %v533_v7 = vadd.f32 %v532_v1, %v197_v55  ;;  %2523 = vmatpush.bf16.msra.mxu0 %v3843_v58  ;;  %v521_v10 = vpop.f32.mrf.mxu1  ;;  %v4100_v55 = vld [vmem:[#allocation8 + $0x5b4] sm:$0xf0]  ;;  %v4642_v58 = vld [vmem:[#allocation8 + $0x2d4] sm:$0xf]  ;;  %v3920_v1 = vld [vmem:[#allocation8 + $0x44c] sm:$0xf0] }
  0xc9   :  { %v546_v8 = vadd.f32 %v545_v2, %v198_v56  ;;  %v4602_v56 = vld [vmem:[#allocation8 + $0x194] sm:$0xf]  ;;  %v4103_v63 = vor.u32 %v4732_v54, %v4100_v55  ;;  %v3720_v9 = vld [vmem:[#allocation8 + $0x2bc] sm:$0xf0]  ;;  %v199_v10 = vperm.slane %v5335_v41, 4  ;;  %v3923_v12 = vor.u32 %v4687_v0, %v3920_v1 }
  0xca   :  { %v590_v17 = vmax.f32 %v533_v7, 0.0  ;;  %v3583_v2 = vor.u32 %v4602_v56, %v3580_v57  ;;  %v3560_v7 = vld [vmem:[#allocation8 + $0x17c] sm:$0xf0]  ;;  %v4822_v54 = vld [vmem:[#allocation8 + $0x874] sm:$0xf] }
  0xcb   :  { %v591_v18 = vmax.f32 %v546_v8, 0.0  ;;  %2511 = vmatpush.bf16.msrb.mxu3 %v3663_v3  ;;  %v3743_v3 = vor.u32 %v4642_v58, %v3740_v59  ;;  %v4637_v8 = vld [vmem:[#allocation8 + $0x2ac] sm:$0xf]  ;;  %v3563_v16 = vor.u32 %v4597_v6, %v3560_v7  ;;  %v4460_v55 = vld [vmem:[#allocation8 + $0x884] sm:$0xf0] }
  0xcc   :  { %v5347_v24 = vpack.c.bf16 %v590_v17, %v590_v17  ;;  %2524 = vmatpush.bf16.msra.mxu0 %v3823_v11  ;;  %v200_v11 = vperm.slane %v5335_v41, 5  ;;  %v3723_v17 = vor.u32 %v4637_v8, %v3720_v9  ;;  %v4672_v56 = vld [vmem:[#allocation8 + $0x3c4] sm:$0xf]  ;;  %v3860_v58 = vld [vmem:[#allocation8 + $0x3d4] sm:$0xf0]  ;;  %v4463_v5 = vor.u32 %v4822_v54, %v4460_v55 }
  0xcd   :  { %v5349_v25 = vpack.c.bf16 %v591_v18, %v591_v18  ;;  %v4722_v18 = vld [vmem:[#allocation8 + $0x554] sm:$0xf]  ;;  %v4712_v41 = vld [vmem:[#allocation8 + $0x504] sm:$0xf]  ;;  %v4020_v59 = vld [vmem:[#allocation8 + $0x514] sm:$0xf0] }
  0xce   :  { %2440 = vmatmul.bf16.vlgmr.msra.gmra.mxu1 %v5347_v24  ;;  %v3526_v0 = vld [vmem:[#allocation8 + $0x120] sm:$0xf]  ;;  %v4590_v6 = vld [vmem:[#allocation8 + $0x130] sm:$0xf0]  ;;  %v4777_v7 = vld [vmem:[#allocation8 + $0x70c] sm:$0xf] }
  0xcf   :  { %2453 = vmatmul.bf16.vlgmr.msra.gmra.mxu2 %v5349_v25  ;;  %2536 = vmatpush.bf16.msra.mxu1 %v4003_v19  ;;  %v534_v33 = vpop.f32.mrf.mxu2  ;;  %v4060_v19 = vld [vmem:[#allocation8 + $0x564] sm:$0xf0]  ;;  %v3686_v1 = vld [vmem:[#allocation8 + $0x260] sm:$0xf] }
  0xd0   :  { %2549 = vmatpush.bf16.msra.mxu2 %v4163_v20  ;;  %v547_v38 = vpop.f32.mrf.mxu3  ;;  %2512 = vmatpush.bf16.msrb.mxu3 %v3643_v21  ;;  %v4592_v20 = vld [vmem:[#allocation8 + $0x144] sm:$0xf]  ;;  %v3903_v33 = vor.u32 %v4682_v14, %v3900_v15  ;;  %v4280_v8 = vld [vmem:[#allocation8 + $0x71c] sm:$0xf0]  ;;  %v4220_v54 = vld [vmem:[#allocation8 + $0x6a4] sm:$0xf0] }
  0xd1   :  { %2525 = vmatpush.bf16.msra.mxu0 %v3803_v26  ;;  %v3700_v26 = vld [vmem:[#allocation8 + $0x294] sm:$0xf0] }
  0xd3   :  { %2537 = vmatpush.bf16.msra.mxu1 %v3983_v34  ;;  %v4063_v34 = vor.u32 %v4722_v18, %v4060_v19  ;;  %v4625_v18 = vld [vmem:[#allocation8 + $0x248] sm:$0xf0]  ;;  %v4283_v19 = vor.u32 %v4777_v7, %v4280_v8  ;;  %v3586_v8 = vld [vmem:[#allocation8 + $0x198] sm:$0xf] }
  0xd4   :  { %2550 = vmatpush.bf16.msra.mxu2 %v4143_v35  ;;  %2513 = vmatpush.bf16.msrb.mxu3 %v3623_v47  ;;  %v4480_v35 = vld [vmem:[#allocation8 + $0x8ac] sm:$0xf0]  ;;  %v3543_v47 = vor.u32 %v4592_v20, %v3540_v22  ;;  %v4585_v22 = vld [vmem:[#allocation8 + $0x108] sm:$0xf0] }
  0xd5   :  { %2526 = vmatpush.bf16.msra.mxu0 %v3783_v39  ;;  %v3703_v39 = vor.u32 %v4632_v23, %v3700_v26  ;;  %v4772_v23 = vld [vmem:[#allocation8 + $0x6e4] sm:$0xf]  ;;  %v4260_v26 = vld [vmem:[#allocation8 + $0x6f4] sm:$0xf0] }
  0xd7   :  { %2538 = vmatpush.bf16.msra.mxu1 %v3963_v48  ;;  %v4483_v48 = vor.u32 %v4827_v31, %v4480_v35 }
  0xd8   :  { %2551 = vmatpush.bf16.msra.mxu2 %v4123_v49  ;;  %2514 = vmatpush.bf16.msrb.mxu3 %v3603_v52  ;;  %v4782_v49 = vld [vmem:[#allocation8 + $0x734] sm:$0xf]  ;;  %v3883_v52 = vor.u32 %v4677_v36, %v3880_v37  ;;  %v3486_v36 = vld [vmem:[#allocation8 + $0xd0] sm:$0xf]  ;;  %v4580_v37 = vld [vmem:[#allocation8 + $0xe0] sm:$0xf0] }
  0xd9   :  { %2527 = vmatpush.bf16.msra.mxu0 %v3763_v53  ;;  %v4043_v53 = vor.u32 %v4717_v40, %v4040_v42  ;;  %v4303_v4 = vor.u32 %v4782_v49, %v4300_v50  ;;  %v4807_v40 = vld [vmem:[#allocation8 + $0x7fc] sm:$0xf]  ;;  %v4400_v42 = vld [vmem:[#allocation8 + $0x80c] sm:$0xf0]  ;;  %v3466_v49 = vld [vmem:[#allocation8 + $0xa8] sm:$0xf] }
  0xda   :  { %v4575_v50 = vld [vmem:[#allocation8 + $0xb8] sm:$0xf0] }
  0xdb   :  { %2539 = vmatpush.bf16.msra.mxu1 %v3943_v60 }
  0xdc   :  { %2552 = vmatpush.bf16.msra.mxu2 %v4103_v63  ;;  %2515 = vmatpush.bf16.msrb.mxu3 %v3583_v2  ;;  %v4630_v2 = vld [vmem:[#allocation8 + $0x270] sm:$0xf0] }
  0xdd   :  { %2528 = vmatpush.bf16.msra.mxu0 %v3743_v3  ;;  %v3687_v14 = vor.u32 %v4630_v2, %v3686_v1  ;;  %v4757_v2 = vld [vmem:[#allocation8 + $0x66c] sm:$0xf] }
  0xdf   :  { %v558_v21 = vpop.f32.mrf.mxu0  ;;  %2505 = vmatmul.bf16.vlgmr.msrb.gmra.mxu2 %v5341_v61  ;;  %2540 = vmatpush.bf16.msra.mxu1 %v3923_v12  ;;  %v4817_v12 = vld [vmem:[#allocation8 + $0x84c] sm:$0xf] }
  0xe0   :  { %v559_v27 = vadd.f32 %v558_v21, %v199_v10  ;;  %v571_v28 = vpop.f32.mrf.mxu1  ;;  %2553 = vmatpush.bf16.msra.mxu2 %v4083_v13  ;;  %2516 = vmatpush.bf16.msrb.mxu3 %v3563_v16  ;;  %v3863_v10 = vor.u32 %v4672_v56, %v3860_v58  ;;  %v4440_v13 = vld [vmem:[#allocation8 + $0x85c] sm:$0xf0]  ;;  %v3527_v16 = vor.u32 %v4590_v6, %v3526_v0  ;;  %v3506_v21 = vld [vmem:[#allocation8 + $0xf8] sm:$0xf]  ;;  %v4802_v56 = vld [vmem:[#allocation8 + $0x7d4] sm:$0xf] }
  0xe1   :  { %v572_v32 = vadd.f32 %v571_v28, %v200_v11  ;;  %2529 = vmatpush.bf16.msra.mxu0 %v3723_v17  ;;  %v4023_v11 = vor.u32 %v4712_v41, %v4020_v59  ;;  %v3666_v17 = vld [vmem:[#allocation8 + $0x238] sm:$0xf]  ;;  %v4443_v20 = vor.u32 %v4817_v12, %v4440_v13  ;;  %v3507_v31 = vor.u32 %v4585_v22, %v3506_v21  ;;  %v3606_v41 = vld [vmem:[#allocation8 + $0x1c0] sm:$0xf]  ;;  %v4610_v59 = vld [vmem:[#allocation8 + $0x1d0] sm:$0xf0] }
  0xe2   :  { %v592_v38 = vmax.f32 %v559_v27, 0.0  ;;  %v4812_v27 = vld [vmem:[#allocation8 + $0x824] sm:$0xf]  ;;  %v4420_v28 = vld [vmem:[#allocation8 + $0x834] sm:$0xf0]  ;;  %v3667_v30 = vor.u32 %v4625_v18, %v3666_v17  ;;  %v3467_v58 = vor.u32 %v4575_v50, %v3466_v49 }
  0xe3   :  { %v593_v43 = vmax.f32 %v572_v32, 0.0  ;;  %2541 = vmatpush.bf16.msra.mxu1 %v3903_v33  ;;  %v3646_v32 = vld [vmem:[#allocation8 + $0x210] sm:$0xf]  ;;  %v4620_v33 = vld [vmem:[#allocation8 + $0x220] sm:$0xf0]  ;;  %v4423_v35 = vor.u32 %v4812_v27, %v4420_v28 }
  0xe4   :  { %v5357_v45 = vpack.c.bf16 %v592_v38, %v592_v38  ;;  %2554 = vmatpush.bf16.msra.mxu2 %v4063_v34  ;;  %2517 = vmatpush.bf16.msrb.mxu3 %v3543_v47  ;;  %v4263_v34 = vor.u32 %v4772_v23, %v4260_v26  ;;  %v4767_v38 = vld [vmem:[#allocation8 + $0x6bc] sm:$0xf]  ;;  %v4240_v47 = vld [vmem:[#allocation8 + $0x6cc] sm:$0xf0]  ;;  %v4570_v0 = vld [vmem:[#allocation8 + $0x90] sm:$0xf0] }
  0xe5   :  { %v5359_v51 = vpack.c.bf16 %v593_v43, %v593_v43  ;;  %2530 = vmatpush.bf16.msra.mxu0 %v3703_v39  ;;  %v3647_v39 = vor.u32 %v4620_v33, %v3646_v32  ;;  %v3487_v43 = vor.u32 %v4580_v37, %v3486_v36  ;;  %v4360_v6 = vld [vmem:[#allocation8 + $0x7bc] sm:$0xf0]  ;;  %v4565_v12 = vld [vmem:[#allocation8 + $0x68] sm:$0xf0]  ;;  %v4752_v13 = vld [vmem:[#allocation8 + $0x644] sm:$0xf] }
  0xe6   :  { %2466 = vmatmul.bf16.vlgmr.msra.gmra.mxu3 %v5357_v45  ;;  %v4792_v17 = vld [vmem:[#allocation8 + $0x784] sm:$0xf]  ;;  %v4340_v18 = vld [vmem:[#allocation8 + $0x794] sm:$0xf0]  ;;  %v4670_v21 = vld [vmem:[#allocation8 + $0x3b0] sm:$0xf0] }
  0xe7   :  { %v584_v57 = vpop.f32.mrf.mxu2  ;;  %2479 = vmatmul.bf16.vlgmr.msrb.gmra.mxu0 %v5359_v51  ;;  %v560_v63 = vpop.f32.mrf.mxu0  ;;  %2542 = vmatpush.bf16.msra.mxu1 %v3883_v52  ;;  %v4403_v52 = vor.u32 %v4807_v40, %v4400_v42  ;;  %v4006_v22 = vld [vmem:[#allocation8 + $0x4e0] sm:$0xf]  ;;  %v4710_v26 = vld [vmem:[#allocation8 + $0x4f0] sm:$0xf0]  ;;  %v3566_v27 = vld [vmem:[#allocation8 + $0x170] sm:$0xf]  ;;  %v4343_v32 = vor.u32 %v4792_v17, %v4340_v18 }
  0xe8   :  { %v585_v60 = vadd.f32 %v584_v57, %v201_v44  ;;  %2562 = vmatpush.bf16.msra.mxu3 %v4323_v46  ;;  %v573_v3 = vpop.f32.mrf.mxu1  ;;  %2555 = vmatpush.bf16.msra.mxu2 %v4043_v53  ;;  %v3626_v44 = vld [vmem:[#allocation8 + $0x1e8] sm:$0xf]  ;;  %v4615_v46 = vld [vmem:[#allocation8 + $0x1f8] sm:$0xf0]  ;;  %v4762_v53 = vld [vmem:[#allocation8 + $0x694] sm:$0xf] }
  0xe9   :  { %2575 = vmatpush.bf16.msrb.mxu0 %v4483_v48  ;;  %v4243_v48 = vor.u32 %v4767_v38, %v4240_v47  ;;  %v3627_v55 = vor.u32 %v4615_v46, %v3626_v44  ;;  %v4380_v57 = vld [vmem:[#allocation8 + $0x7e4] sm:$0xf0]  ;;  %v3446_v63 = vld [vmem:[#allocation8 + $0x80] sm:$0xf]  ;;  %v4600_v28 = vld [vmem:[#allocation8 + $0x180] sm:$0xf0] }
  0xea   :  { %v594_v9 = vmax.f32 %v585_v60, 0.0  ;;  %v4223_v60 = vor.u32 %v4762_v53, %v4220_v54  ;;  %v4383_v1 = vor.u32 %v4802_v56, %v4380_v57  ;;  %v4200_v3 = vld [vmem:[#allocation8 + $0x67c] sm:$0xf0]  ;;  %v3447_v7 = vor.u32 %v4570_v0, %v3446_v63  ;;  %v4665_v37 = vld [vmem:[#allocation8 + $0x388] sm:$0xf0] }
  0xeb   :  { %2543 = vmatpush.bf16.msra.mxu1 %v3863_v10  ;;  %v4203_v10 = vor.u32 %v4757_v2, %v4200_v3  ;;  %v3567_v36 = vor.u32 %v4600_v28, %v3566_v27  ;;  %v3986_v38 = vld [vmem:[#allocation8 + $0x4b8] sm:$0xf]  ;;  %v4705_v47 = vld [vmem:[#allocation8 + $0x4c8] sm:$0xf0]  ;;  %v3386_v40 = vld [vmem:[#allocation8 + $0x8] sm:$0xf] }
  0xec   :  { %v5363_v15 = vpack.c.bf16 %v594_v9, %v594_v9  ;;  %2563 = vmatpush.bf16.msra.mxu3 %v4303_v4  ;;  %2556 = vmatpush.bf16.msra.mxu2 %v4023_v11  ;;  %v3607_v4 = vor.u32 %v4610_v59, %v3606_v41  ;;  %v4605_v9 = vld [vmem:[#allocation8 + $0x1a8] sm:$0xf0]  ;;  %v3426_v11 = vld [vmem:[#allocation8 + $0x58] sm:$0xf]  ;;  %v3546_v42 = vld [vmem:[#allocation8 + $0x148] sm:$0xf]  ;;  %v3987_v53 = vor.u32 %v4705_v47, %v3986_v38 }
  0xed   :  { %2576 = vmatpush.bf16.msrb.mxu0 %v4463_v5  ;;  %v4797_v5 = vld [vmem:[#allocation8 + $0x7ac] sm:$0xf]  ;;  %v3427_v23 = vor.u32 %v4565_v12, %v3426_v11  ;;  %v4555_v44 = vld [vmem:[#allocation8 + $0x18] sm:$0xf0]  ;;  %v4326_v46 = vld [vmem:[#allocation8 + $0x760] sm:$0xf] }
  0xee   :  { %2492 = vmatmul.bf16.vlgmr.msrb.gmra.mxu1 %v5363_v15  ;;  %v4166_v50 = vld [vmem:[#allocation8 + $0x620] sm:$0xf]  ;;  %v4660_v56 = vld [vmem:[#allocation8 + $0x360] sm:$0xf0]  ;;  %v3387_v57 = vor.u32 %v4555_v44, %v3386_v40  ;;  %v3966_v41 = vld [vmem:[#allocation8 + $0x490] sm:$0xf] }
  0xef   :  { %v586_v29 = vpop.f32.mrf.mxu2  ;;  %2588 = vmatpush.bf16.msrb.mxu1 %v3527_v16  ;;  %2557 = vmatmul.bf16.vlgmr.msra.gmra.mxu2 %v5357_v45  ;;  %v4180_v16 = vld [vmem:[#allocation8 + $0x654] sm:$0xf0]  ;;  %v4700_v59 = vld [vmem:[#allocation8 + $0x4a0] sm:$0xf0]  ;;  %v4785_v0 = vld [vmem:[#allocation8 + $0x748] sm:$0xf0] }
  0xf0   :  { %2601 = vmatpush.bf16.msrb.mxu2 %v3687_v14  ;;  %2564 = vmatpush.bf16.msra.mxu3 %v4283_v19  ;;  %v4363_v14 = vor.u32 %v4797_v5, %v4360_v6  ;;  %v3587_v19 = vor.u32 %v4605_v9, %v3586_v8  ;;  %v4183_v29 = vor.u32 %v4752_v13, %v4180_v16  ;;  %v4306_v63 = vld [vmem:[#allocation8 + $0x738] sm:$0xf]  ;;  %v4745_v3 = vld [vmem:[#allocation8 + $0x608] sm:$0xf0]  ;;  %v3786_v5 = vld [vmem:[#allocation8 + $0x328] sm:$0xf] }
  0xf1   :  { %2577 = vmatpush.bf16.msrb.mxu0 %v4443_v20  ;;  %v3846_v20 = vld [vmem:[#allocation8 + $0x3a0] sm:$0xf]  ;;  %v4146_v2 = vld [vmem:[#allocation8 + $0x5f8] sm:$0xf]  ;;  %v4655_v6 = vld [vmem:[#allocation8 + $0x338] sm:$0xf0] }
  0xf2   :  { %v3847_v33 = vor.u32 %v4670_v21, %v3846_v20  ;;  %v3946_v8 = vld [vmem:[#allocation8 + $0x468] sm:$0xf]  ;;  %v4695_v9 = vld [vmem:[#allocation8 + $0x478] sm:$0xf0]  ;;  %v4286_v11 = vld [vmem:[#allocation8 + $0x710] sm:$0xf]  ;;  %v3787_v13 = vor.u32 %v4655_v6, %v3786_v5 }
  0xf3   :  { %2589 = vmatpush.bf16.msrb.mxu1 %v3507_v31  ;;  %v4560_v31 = vld [vmem:[#allocation8 + $0x40] sm:$0xf0]  ;;  %v3947_v17 = vor.u32 %v4695_v9, %v3946_v8  ;;  %v3766_v18 = vld [vmem:[#allocation8 + $0x300] sm:$0xf]  ;;  %v4775_v27 = vld [vmem:[#allocation8 + $0x6f8] sm:$0xf0] }
  0xf4   :  { %2602 = vmatpush.bf16.msrb.mxu2 %v3667_v30  ;;  %2565 = vmatpush.bf16.msra.mxu3 %v4263_v34  ;;  %v3406_v30 = vld [vmem:[#allocation8 + $0x30] sm:$0xf]  ;;  %v3826_v34 = vld [vmem:[#allocation8 + $0x378] sm:$0xf]  ;;  %v4780_v12 = vld [vmem:[#allocation8 + $0x720] sm:$0xf0] }
  0xf5   :  { %2578 = vmatpush.bf16.msrb.mxu0 %v4423_v35  ;;  %v4007_v35 = vor.u32 %v4710_v26, %v4006_v22  ;;  %v3827_v49 = vor.u32 %v4665_v37, %v3826_v34  ;;  %v4740_v16 = vld [vmem:[#allocation8 + $0x5e0] sm:$0xf0]  ;;  %v4287_v20 = vor.u32 %v4780_v12, %v4286_v11  ;;  %v3926_v21 = vld [vmem:[#allocation8 + $0x440] sm:$0xf]  ;;  %v4690_v22 = vld [vmem:[#allocation8 + $0x450] sm:$0xf0] }
  0xf6   :  { %2518 = vmatmul.bf16.vlgmr.msrb.gmra.mxu3 %v5343_v62  ;;  %v4266_v26 = vld [vmem:[#allocation8 + $0x6e8] sm:$0xf]  ;;  %v4246_v38 = vld [vmem:[#allocation8 + $0x6c0] sm:$0xf]  ;;  %v4770_v47 = vld [vmem:[#allocation8 + $0x6d0] sm:$0xf0] }
  0xf7   :  { %2590 = vmatpush.bf16.msrb.mxu1 %v3487_v43  ;;  %2531 = vmatmul.bf16.vlgmr.msra.gmra.mxu0 %v5347_v24  ;;  %v4595_v43 = vld [vmem:[#allocation8 + $0x158] sm:$0xf0]  ;;  %v4267_v34 = vor.u32 %v4775_v27, %v4266_v26  ;;  %v4086_v40 = vld [vmem:[#allocation8 + $0x580] sm:$0xf]  ;;  %v3726_v44 = vld [vmem:[#allocation8 + $0x2b0] sm:$0xf] }
  0xf8   :  { %2603 = vmatpush.bf16.msrb.mxu2 %v3647_v39  ;;  %2566 = vmatpush.bf16.msra.mxu3 %v4243_v48  ;;  %v3407_v39 = vor.u32 %v4560_v31, %v3406_v30  ;;  %v4790_v48 = vld [vmem:[#allocation8 + $0x770] sm:$0xf0]  ;;  %v3547_v54 = vor.u32 %v4595_v43, %v3546_v42  ;;  %v4735_v30 = vld [vmem:[#allocation8 + $0x5b8] sm:$0xf0]  ;;  %v3927_v31 = vor.u32 %v4690_v22, %v3926_v21  ;;  %v3528_v5 = vld [vmem:[#allocation8 + $0x134] sm:$0xf0] }
  0xf9   :  { %2579 = vmatpush.bf16.msrb.mxu0 %v4403_v52  ;;  %v4750_v52 = vld [vmem:[#allocation8 + $0x630] sm:$0xf0]  ;;  %v4206_v6 = vld [vmem:[#allocation8 + $0x670] sm:$0xf]  ;;  %v4026_v21 = vld [vmem:[#allocation8 + $0x508] sm:$0xf] }
  0xfa   :  { %v4730_v42 = vld [vmem:[#allocation8 + $0x590] sm:$0xf0]  ;;  %v4046_v9 = vld [vmem:[#allocation8 + $0x530] sm:$0xf]  ;;  %v4186_v22 = vld [vmem:[#allocation8 + $0x648] sm:$0xf] }
  0xfb   :  { %2591 = vmatpush.bf16.msrb.mxu1 %v3467_v58  ;;  %v4327_v58 = vor.u32 %v4790_v48, %v4326_v46  ;;  %v4640_v46 = vld [vmem:[#allocation8 + $0x2c0] sm:$0xf0]  ;;  %v4247_v48 = vor.u32 %v4770_v47, %v4246_v38  ;;  %v4715_v26 = vld [vmem:[#allocation8 + $0x518] sm:$0xf0]  ;;  %v4578_v38 = vld [vmem:[#allocation8 + $0xd4] sm:$0xf] }
  0xfc   :  { %2604 = vmatpush.bf16.msrb.mxu2 %v3627_v55  ;;  %2567 = vmatpush.bf16.msra.mxu3 %v4223_v60  ;;  %v3806_v55 = vld [vmem:[#allocation8 + $0x350] sm:$0xf]  ;;  %v4167_v60 = vor.u32 %v4750_v52, %v4166_v50  ;;  %v4680_v50 = vld [vmem:[#allocation8 + $0x400] sm:$0xf0]  ;;  %v4087_v52 = vor.u32 %v4730_v42, %v4086_v40  ;;  %v3488_v47 = vld [vmem:[#allocation8 + $0xe4] sm:$0xf0] }
  0xfd   :  { %2580 = vmatpush.bf16.msrb.mxu0 %v4383_v1  ;;  %v3807_v1 = vor.u32 %v4660_v56, %v3806_v55  ;;  %v3727_v55 = vor.u32 %v4640_v46, %v3726_v44  ;;  %v4066_v56 = vld [vmem:[#allocation8 + $0x558] sm:$0xf]  ;;  %v4668_v27 = vld [vmem:[#allocation8 + $0x3a4] sm:$0xf]  ;;  %v4663_v40 = vld [vmem:[#allocation8 + $0x37c] sm:$0xf] }
  0xfe   :  { %2544 = vmatmul.bf16.vlgmr.msra.gmra.mxu1 %v5349_v25  ;;  %v3828_v42 = vld [vmem:[#allocation8 + $0x38c] sm:$0xf0]  ;;  %v4623_v44 = vld [vmem:[#allocation8 + $0x23c] sm:$0xf] }
  0xff   :  { %2592 = vmatpush.bf16.msrb.mxu1 %v3447_v7  ;;  %v4307_v7 = vor.u32 %v4785_v0, %v4306_v63  ;;  %v4675_v63 = vld [vmem:[#allocation8 + $0x3d8] sm:$0xf0]  ;;  %v3668_v46 = vld [vmem:[#allocation8 + $0x24c] sm:$0xf0] }
 0x100   :  { %2605 = vmatpush.bf16.msrb.mxu2 %v3607_v4  ;;  %2568 = vmatpush.bf16.msra.mxu3 %v4203_v10  ;;  %v3967_v4 = vor.u32 %v4700_v59, %v3966_v41  ;;  %v4147_v10 = vor.u32 %v4745_v3, %v4146_v2  ;;  %v4635_v59 = vld [vmem:[#allocation8 + $0x298] sm:$0xf0]  ;;  %v4830_v2 = vld [vmem:[#allocation8 + $0x8b0] sm:$0xf0]  ;;  %v4588_v3 = vld [vmem:[#allocation8 + $0x124] sm:$0xf] }
 0x101   :  { %2581 = vmatpush.bf16.msrb.mxu0 %v4363_v14  ;;  %v4126_v14 = vld [vmem:[#allocation8 + $0x5d0] sm:$0xf] }
 0x103   :  { %2593 = vmatpush.bf16.msrb.mxu1 %v3427_v23  ;;  %v4127_v23 = vor.u32 %v4740_v16, %v4126_v14  ;;  %v3531_v14 = vor.u32 %v4588_v3, %v3528_v5  ;;  %v3448_v3 = vld [vmem:[#allocation8 + $0x94] sm:$0xf0]  ;;  %v4653_v5 = vld [vmem:[#allocation8 + $0x32c] sm:$0xf] }
 0x104   :  { %2606 = vmatpush.bf16.msrb.mxu2 %v3587_v19  ;;  %2569 = vmatpush.bf16.msra.mxu3 %v4183_v29  ;;  %v4650_v19 = vld [vmem:[#allocation8 + $0x310] sm:$0xf0]  ;;  %v4106_v29 = vld [vmem:[#allocation8 + $0x5a8] sm:$0xf] }
 0x105   :  { %2582 = vmatpush.bf16.msrb.mxu0 %v4343_v32  ;;  %v3767_v28 = vor.u32 %v4650_v19, %v3766_v18  ;;  %v3746_v32 = vld [vmem:[#allocation8 + $0x2d8] sm:$0xf]  ;;  %v4107_v37 = vor.u32 %v4735_v30, %v4106_v29  ;;  %v4583_v18 = vld [vmem:[#allocation8 + $0xfc] sm:$0xf]  ;;  %v3508_v19 = vld [vmem:[#allocation8 + $0x10c] sm:$0xf0] }
 0x106   :  { %v4628_v30 = vld [vmem:[#allocation8 + $0x264] sm:$0xf] }
 0x107   :  { %2594 = vmatpush.bf16.msrb.mxu1 %v3407_v39  ;;  %2570 = vmatmul.bf16.vlgmr.msra.gmra.mxu3 %v5359_v51 }
 0x108   :  { %2614 = vmatpush.bf16.msrb.mxu3 %v3847_v33  ;;  %2607 = vmatpush.bf16.msrb.mxu2 %v3567_v36  ;;  %v4645_v33 = vld [vmem:[#allocation8 + $0x2e8] sm:$0xf0] }
 0x109   :  { %2627 = vmatpush.bf16.msra.mxu0 %v4007_v35  ;;  %v3906_v35 = vld [vmem:[#allocation8 + $0x418] sm:$0xf]  ;;  %v4685_v36 = vld [vmem:[#allocation8 + $0x428] sm:$0xf0]  ;;  %v3747_v39 = vor.u32 %v4645_v33, %v3746_v32  ;;  %v3511_v32 = vor.u32 %v4583_v18, %v3508_v19  ;;  %v4648_v18 = vld [vmem:[#allocation8 + $0x304] sm:$0xf] }
 0x10a   :  { %2583 = vmatmul.bf16.vlgmr.msrb.gmra.mxu0 %v5363_v15  ;;  %v3907_v43 = vor.u32 %v4685_v36, %v3906_v35  ;;  %v4820_v35 = vld [vmem:[#allocation8 + $0x860] sm:$0xf0]  ;;  %v4027_v36 = vor.u32 %v4715_v26, %v4026_v21  ;;  %v3768_v19 = vld [vmem:[#allocation8 + $0x314] sm:$0xf0]  ;;  %v4366_v26 = vld [vmem:[#allocation8 + $0x7b0] sm:$0xf] }
 0x10b   :  { %2595 = vmatpush.bf16.msrb.mxu1 %v3387_v57  ;;  %v4725_v57 = vld [vmem:[#allocation8 + $0x568] sm:$0xf0]  ;;  %v4608_v21 = vld [vmem:[#allocation8 + $0x1c4] sm:$0xf] }
 0x10c   :  { %2615 = vmatpush.bf16.msrb.mxu3 %v3827_v49  ;;  %2608 = vmatpush.bf16.msrb.mxu2 %v3547_v54  ;;  %v3886_v49 = vld [vmem:[#allocation8 + $0x3f0] sm:$0xf]  ;;  %v4765_v54 = vld [vmem:[#allocation8 + $0x6a8] sm:$0xf0] }
 0x10d   :  { %2628 = vmatpush.bf16.msra.mxu0 %v3987_v53  ;;  %v4226_v53 = vld [vmem:[#allocation8 + $0x698] sm:$0xf]  ;;  %v3887_v41 = vor.u32 %v4680_v50, %v3886_v49  ;;  %v4426_v49 = vld [vmem:[#allocation8 + $0x828] sm:$0xf]  ;;  %v4815_v50 = vld [vmem:[#allocation8 + $0x838] sm:$0xf0] }
 0x10e   :  { %2596 = vmatmul.bf16.vlgmr.msrb.gmra.mxu1 %v5341_v61  ;;  %v4227_v0 = vor.u32 %v4765_v54, %v4226_v53  ;;  %v4573_v53 = vld [vmem:[#allocation8 + $0xac] sm:$0xf]  ;;  %v3468_v54 = vld [vmem:[#allocation8 + $0xbc] sm:$0xf0] }
 0x10f   :  { %2640 = vmatpush.bf16.msra.mxu1 %v4167_v60  ;;  %2609 = vmatmul.bf16.vlgmr.msrb.gmra.mxu2 %v5343_v62  ;;  %v3866_v60 = vld [vmem:[#allocation8 + $0x3c8] sm:$0xf] }
 0x110   :  { %2653 = vmatpush.bf16.msra.mxu2 %v4327_v58  ;;  %2616 = vmatpush.bf16.msrb.mxu3 %v3807_v1  ;;  %v3706_v58 = vld [vmem:[#allocation8 + $0x288] sm:$0xf]  ;;  %v4486_v1 = vld [vmem:[#allocation8 + $0x8a0] sm:$0xf]  ;;  %v3867_v11 = vor.u32 %v4675_v63, %v3866_v60  ;;  %v3471_v60 = vor.u32 %v4573_v53, %v3468_v54  ;;  %v4598_v54 = vld [vmem:[#allocation8 + $0x174] sm:$0xf] }
 0x111   :  { %2629 = vmatpush.bf16.msra.mxu0 %v3967_v4  ;;  %v4067_v4 = vor.u32 %v4725_v57, %v4066_v56  ;;  %v3707_v8 = vor.u32 %v4635_v59, %v3706_v58  ;;  %v4487_v12 = vor.u32 %v4830_v2, %v4486_v1  ;;  %v4658_v56 = vld [vmem:[#allocation8 + $0x354] sm:$0xf]  ;;  %v3808_v57 = vld [vmem:[#allocation8 + $0x364] sm:$0xf0]  ;;  %v4427_v58 = vor.u32 %v4815_v50, %v4426_v49  ;;  %v4406_v63 = vld [vmem:[#allocation8 + $0x800] sm:$0xf] }
 0x112   :  { %v3648_v59 = vld [vmem:[#allocation8 + $0x224] sm:$0xf0]  ;;  %v3811_v1 = vor.u32 %v4658_v56, %v3808_v57  ;;  %v4568_v2 = vld [vmem:[#allocation8 + $0x84] sm:$0xf]  ;;  %v4168_v49 = vld [vmem:[#allocation8 + $0x634] sm:$0xf0] }
 0x113   :  { %2641 = vmatpush.bf16.msra.mxu1 %v4147_v10  ;;  %v4720_v10 = vld [vmem:[#allocation8 + $0x540] sm:$0xf0]  ;;  %v4638_v50 = vld [vmem:[#allocation8 + $0x2b4] sm:$0xf] }
 0x114   :  { %2654 = vmatpush.bf16.msra.mxu2 %v4307_v7  ;;  %2617 = vmatpush.bf16.msrb.mxu3 %v3787_v13  ;;  %v4760_v7 = vld [vmem:[#allocation8 + $0x680] sm:$0xf0]  ;;  %v4466_v13 = vld [vmem:[#allocation8 + $0x878] sm:$0xf] }
 0x115   :  { %2630 = vmatpush.bf16.msra.mxu0 %v3947_v17  ;;  %v4207_v16 = vor.u32 %v4760_v7, %v4206_v6  ;;  %v4825_v17 = vld [vmem:[#allocation8 + $0x888] sm:$0xf0]  ;;  %v3788_v6 = vld [vmem:[#allocation8 + $0x33c] sm:$0xf0] }
 0x116   :  { %v4467_v29 = vor.u32 %v4825_v17, %v4466_v13  ;;  %v3791_v13 = vor.u32 %v4653_v5, %v3788_v6  ;;  %v3548_v5 = vld [vmem:[#allocation8 + $0x15c] sm:$0xf0]  ;;  %v4828_v6 = vld [vmem:[#allocation8 + $0x8a4] sm:$0xf] }
 0x117   :  { %2642 = vmatpush.bf16.msra.mxu1 %v4127_v23  ;;  %v4755_v23 = vld [vmem:[#allocation8 + $0x658] sm:$0xf0] }
 0x118   :  { %2655 = vmatpush.bf16.msra.mxu2 %v4287_v20  ;;  %2618 = vmatpush.bf16.msrb.mxu3 %v3767_v28  ;;  %v4047_v20 = vor.u32 %v4720_v10, %v4046_v9  ;;  %v3848_v28 = vld [vmem:[#allocation8 + $0x3b4] sm:$0xf0]  ;;  %v4187_v33 = vor.u32 %v4755_v23, %v4186_v22  ;;  %v3628_v9 = vld [vmem:[#allocation8 + $0x1fc] sm:$0xf0]  ;;  %v3451_v10 = vor.u32 %v4568_v2, %v3448_v3  ;;  %v4593_v2 = vld [vmem:[#allocation8 + $0x14c] sm:$0xf] }
 0x119   :  { %2631 = vmatpush.bf16.msra.mxu0 %v3927_v31  ;;  %v3688_v31 = vld [vmem:[#allocation8 + $0x274] sm:$0xf0]  ;;  %v4633_v3 = vld [vmem:[#allocation8 + $0x28c] sm:$0xf] }
 0x11a   :  { %v3608_v22 = vld [vmem:[#allocation8 + $0x1d4] sm:$0xf0] }
 0x11b   :  { %2643 = vmatpush.bf16.msra.mxu1 %v4107_v37  ;;  %v3851_v37 = vor.u32 %v4668_v27, %v3848_v28  ;;  %v4800_v27 = vld [vmem:[#allocation8 + $0x7c0] sm:$0xf0]  ;;  %v3771_v28 = vor.u32 %v4648_v18, %v3768_v19  ;;  %v4738_v18 = vld [vmem:[#allocation8 + $0x5d4] sm:$0xf]  ;;  %v4128_v19 = vld [vmem:[#allocation8 + $0x5e4] sm:$0xf0] }
 0x11c   :  { %2656 = vmatpush.bf16.msra.mxu2 %v4267_v34  ;;  %2619 = vmatpush.bf16.msrb.mxu3 %v3747_v39  ;;  %v4446_v34 = vld [vmem:[#allocation8 + $0x850] sm:$0xf]  ;;  %v3691_v39 = vor.u32 %v4628_v30, %v3688_v31  ;;  %v3408_v30 = vld [vmem:[#allocation8 + $0x44] sm:$0xf0]  ;;  %v3611_v31 = vor.u32 %v4608_v21, %v3608_v22  ;;  %v4823_v21 = vld [vmem:[#allocation8 + $0x87c] sm:$0xf] }
 0x11d   :  { %2632 = vmatpush.bf16.msra.mxu0 %v3907_v43  ;;  %v4447_v43 = vor.u32 %v4820_v35, %v4446_v34  ;;  %v4367_v34 = vor.u32 %v4800_v27, %v4366_v26  ;;  %v4603_v35 = vld [vmem:[#allocation8 + $0x19c] sm:$0xf]  ;;  %v4468_v22 = vld [vmem:[#allocation8 + $0x88c] sm:$0xf0] }
 0x11e   :  { %v4783_v26 = vld [vmem:[#allocation8 + $0x73c] sm:$0xf]  ;;  %v4308_v27 = vld [vmem:[#allocation8 + $0x74c] sm:$0xf0] }
 0x11f   :  { %2644 = vmatpush.bf16.msra.mxu1 %v4087_v52  ;;  %v3831_v52 = vor.u32 %v4663_v40, %v3828_v42  ;;  %v3388_v40 = vld [vmem:[#allocation8 + $0x1c] sm:$0xf0] }
 0x120   :  { %2657 = vmatpush.bf16.msra.mxu2 %v4247_v48  ;;  %2620 = vmatpush.bf16.msrb.mxu3 %v3727_v55  ;;  %v3491_v48 = vor.u32 %v4578_v38, %v3488_v47  ;;  %v3671_v55 = vor.u32 %v4623_v44, %v3668_v46  ;;  %v4795_v47 = vld [vmem:[#allocation8 + $0x798] sm:$0xf0]  ;;  %v4008_v44 = vld [vmem:[#allocation8 + $0x4f4] sm:$0xf0]  ;;  %v4748_v46 = vld [vmem:[#allocation8 + $0x624] sm:$0xf] }
 0x121   :  { %2633 = vmatpush.bf16.msra.mxu0 %v3887_v41  ;;  %v4618_v41 = vld [vmem:[#allocation8 + $0x214] sm:$0xf] }
 0x123   :  { %2645 = vmatpush.bf16.msra.mxu1 %v4067_v4  ;;  %v3651_v4 = vor.u32 %v4618_v41, %v3648_v59  ;;  %v4171_v41 = vor.u32 %v4748_v46, %v4168_v49  ;;  %v4728_v49 = vld [vmem:[#allocation8 + $0x584] sm:$0xf] }
 0x124   :  { %2658 = vmatpush.bf16.msra.mxu2 %v4227_v0  ;;  %2621 = vmatpush.bf16.msrb.mxu3 %v3707_v8  ;;  %v4810_v0 = vld [vmem:[#allocation8 + $0x810] sm:$0xf0]  ;;  %v4613_v8 = vld [vmem:[#allocation8 + $0x1ec] sm:$0xf] }
 0x125   :  { %2634 = vmatpush.bf16.msra.mxu0 %v3867_v11  ;;  %v4407_v7 = vor.u32 %v4810_v0, %v4406_v63  ;;  %v4386_v11 = vld [vmem:[#allocation8 + $0x7d8] sm:$0xf]  ;;  %v3631_v17 = vor.u32 %v4613_v8, %v3628_v9  ;;  %v4743_v63 = vld [vmem:[#allocation8 + $0x5fc] sm:$0xf]  ;;  %v4148_v0 = vld [vmem:[#allocation8 + $0x60c] sm:$0xf0] }
 0x126   :  { %v4788_v9 = vld [vmem:[#allocation8 + $0x764] sm:$0xf] }
 0x127   :  { %2646 = vmatpush.bf16.msra.mxu1 %v4047_v20  ;;  %2622 = vmatmul.bf16.vlgmr.msrb.gmra.mxu3 %v5347_v24 }
 0x128   :  { %2666 = vmatpush.bf16.msra.mxu3 %v4487_v12  ;;  %2659 = vmatpush.bf16.msra.mxu2 %v4207_v16  ;;  %v4805_v12 = vld [vmem:[#allocation8 + $0x7e8] sm:$0xf0]  ;;  %v3428_v16 = vld [vmem:[#allocation8 + $0x6c] sm:$0xf0] }
 0x129   :  { %2679 = vmatpush.bf16.msrb.mxu0 %v3531_v14  ;;  %v4563_v14 = vld [vmem:[#allocation8 + $0x5c] sm:$0xf]  ;;  %v4387_v20 = vor.u32 %v4805_v12, %v4386_v11  ;;  %v4151_v11 = vor.u32 %v4743_v63, %v4148_v0 }
 0x12a   :  { %2635 = vmatmul.bf16.vlgmr.msra.gmra.mxu0 %v5349_v25  ;;  %v3431_v23 = vor.u32 %v4563_v14, %v3428_v16  ;;  %v3968_v14 = vld [vmem:[#allocation8 + $0x4a4] sm:$0xf0]  ;;  %v3551_v16 = vor.u32 %v4593_v2, %v3548_v5  ;;  %v4723_v2 = vld [vmem:[#allocation8 + $0x55c] sm:$0xf] }
 0x12b   :  { %2647 = vmatpush.bf16.msra.mxu1 %v4027_v36  ;;  %v3588_v36 = vld [vmem:[#allocation8 + $0x1ac] sm:$0xf0] }
 0x12c   :  { %2667 = vmatpush.bf16.msra.mxu3 %v4467_v29  ;;  %2660 = vmatpush.bf16.msra.mxu2 %v4187_v33  ;;  %v4558_v29 = vld [vmem:[#allocation8 + $0x34] sm:$0xf]  ;;  %v3748_v33 = vld [vmem:[#allocation8 + $0x2ec] sm:$0xf0] }
 0x12d   :  { %2680 = vmatpush.bf16.msrb.mxu0 %v3511_v32  ;;  %v4643_v32 = vld [vmem:[#allocation8 + $0x2dc] sm:$0xf]  ;;  %v3411_v38 = vor.u32 %v4558_v29, %v3408_v30  ;;  %v4693_v29 = vld [vmem:[#allocation8 + $0x46c] sm:$0xf]  ;;  %v3948_v30 = vld [vmem:[#allocation8 + $0x47c] sm:$0xf0] }
 0x12e   :  { %2648 = vmatmul.bf16.vlgmr.msra.gmra.mxu1 %v5357_v45  ;;  %v3751_v42 = vor.u32 %v4643_v32, %v3748_v33  ;;  %v4733_v32 = vld [vmem:[#allocation8 + $0x5ac] sm:$0xf]  ;;  %v4108_v33 = vld [vmem:[#allocation8 + $0x5bc] sm:$0xf0] }
 0x12f   :  { %2692 = vmatpush.bf16.msrb.mxu1 %v3691_v39  ;;  %2661 = vmatmul.bf16.vlgmr.msra.gmra.mxu2 %v5359_v51  ;;  %v4553_v39 = vld [vmem:[#allocation8 + $0xc] sm:$0xf] }
 0x130   :  { %2705 = vmatpush.bf16.msrb.mxu2 %v3851_v37  ;;  %2668 = vmatpush.bf16.msra.mxu3 %v4447_v43  ;;  %v4346_v37 = vld [vmem:[#allocation8 + $0x788] sm:$0xf]  ;;  %v4708_v43 = vld [vmem:[#allocation8 + $0x4e4] sm:$0xf]  ;;  %v3391_v56 = vor.u32 %v4553_v39, %v3388_v40  ;;  %v4778_v39 = vld [vmem:[#allocation8 + $0x714] sm:$0xf] }
 0x131   :  { %2681 = vmatpush.bf16.msrb.mxu0 %v3491_v48  ;;  %v3591_v48 = vor.u32 %v4603_v35, %v3588_v36  ;;  %v4347_v53 = vor.u32 %v4795_v47, %v4346_v37  ;;  %v4011_v57 = vor.u32 %v4708_v43, %v4008_v44  ;;  %v4311_v35 = vor.u32 %v4783_v26, %v4308_v27  ;;  %v4818_v36 = vld [vmem:[#allocation8 + $0x854] sm:$0xf]  ;;  %v4448_v37 = vld [vmem:[#allocation8 + $0x864] sm:$0xf0]  ;;  %v4688_v43 = vld [vmem:[#allocation8 + $0x444] sm:$0xf] }
 0x132   :  { %v3951_v47 = vor.u32 %v4693_v29, %v3948_v30  ;;  %v4288_v40 = vld [vmem:[#allocation8 + $0x724] sm:$0xf0]  ;;  %v3928_v44 = vld [vmem:[#allocation8 + $0x454] sm:$0xf0]  ;;  %v4451_v46 = vor.u32 %v4818_v36, %v4448_v37  ;;  %v4763_v27 = vld [vmem:[#allocation8 + $0x69c] sm:$0xf] }
 0x133   :  { %2693 = vmatpush.bf16.msrb.mxu1 %v3671_v55  ;;  %v3568_v55 = vld [vmem:[#allocation8 + $0x184] sm:$0xf0]  ;;  %v4673_v29 = vld [vmem:[#allocation8 + $0x3cc] sm:$0xf] }
 0x134   :  { %2706 = vmatpush.bf16.msrb.mxu2 %v3831_v52  ;;  %2669 = vmatpush.bf16.msra.mxu3 %v4427_v58  ;;  %v3728_v52 = vld [vmem:[#allocation8 + $0x2c4] sm:$0xf0]  ;;  %v4703_v58 = vld [vmem:[#allocation8 + $0x4bc] sm:$0xf] }
 0x135   :  { %2682 = vmatpush.bf16.msrb.mxu0 %v3471_v60  ;;  %v3731_v59 = vor.u32 %v4638_v50, %v3728_v52  ;;  %v3988_v60 = vld [vmem:[#allocation8 + $0x4cc] sm:$0xf0]  ;;  %v4088_v50 = vld [vmem:[#allocation8 + $0x594] sm:$0xf0]  ;;  %v4291_v52 = vor.u32 %v4778_v39, %v4288_v40  ;;  %v4591_v39 = vld [vmem:[#allocation8 + $0x138] sm:$0xf0] }
 0x136   :  { %v3991_v8 = vor.u32 %v4703_v58, %v3988_v60  ;;  %v3908_v60 = vld [vmem:[#allocation8 + $0x42c] sm:$0xf0]  ;;  %v3694_v40 = vld [vmem:[#allocation8 + $0x268] sm:$0xf] }
 0x137   :  { %2694 = vmatpush.bf16.msrb.mxu1 %v3651_v4  ;;  %v3708_v4 = vld [vmem:[#allocation8 + $0x29c] sm:$0xf0] }
 0x138   :  { %2707 = vmatpush.bf16.msrb.mxu2 %v3811_v1  ;;  %2670 = vmatpush.bf16.msra.mxu3 %v4407_v7  ;;  %v3571_v1 = vor.u32 %v4598_v54, %v3568_v55  ;;  %v4488_v7 = vld [vmem:[#allocation8 + $0x8b4] sm:$0xf0]  ;;  %v3711_v12 = vor.u32 %v4633_v3, %v3708_v4  ;;  %v4428_v54 = vld [vmem:[#allocation8 + $0x83c] sm:$0xf0]  ;;  %v3931_v55 = vor.u32 %v4688_v43, %v3928_v44  ;;  %v4068_v3 = vld [vmem:[#allocation8 + $0x56c] sm:$0xf0] }
 0x139   :  { %2683 = vmatpush.bf16.msrb.mxu0 %v3451_v10  ;;  %v4328_v10 = vld [vmem:[#allocation8 + $0x774] sm:$0xf0]  ;;  %v4631_v43 = vld [vmem:[#allocation8 + $0x278] sm:$0xf0]  ;;  %v4798_v44 = vld [vmem:[#allocation8 + $0x7b4] sm:$0xf] }
 0x13b   :  { %2695 = vmatpush.bf16.msrb.mxu1 %v3631_v17  ;;  %v4491_v17 = vor.u32 %v4828_v6, %v4488_v7  ;;  %v4808_v6 = vld [vmem:[#allocation8 + $0x804] sm:$0xf]  ;;  %v4408_v7 = vld [vmem:[#allocation8 + $0x814] sm:$0xf0] }
 0x13c   :  { %2708 = vmatpush.bf16.msrb.mxu2 %v3791_v13  ;;  %2671 = vmatpush.bf16.msra.mxu3 %v4387_v20  ;;  %v4698_v13 = vld [vmem:[#allocation8 + $0x494] sm:$0xf]  ;;  %v4331_v20 = vor.u32 %v4788_v9, %v4328_v10  ;;  %v4768_v10 = vld [vmem:[#allocation8 + $0x6c4] sm:$0xf] }
 0x13d   :  { %2684 = vmatpush.bf16.msrb.mxu0 %v3431_v23  ;;  %v3971_v23 = vor.u32 %v4698_v13, %v3968_v14  ;;  %v4678_v13 = vld [vmem:[#allocation8 + $0x3f4] sm:$0xf]  ;;  %v3888_v14 = vld [vmem:[#allocation8 + $0x404] sm:$0xf0] }
 0x13e   :  { %v3891_v26 = vor.u32 %v4678_v13, %v3888_v14  ;;  %v3654_v14 = vld [vmem:[#allocation8 + $0x218] sm:$0xf] }
 0x13f   :  { %2696 = vmatpush.bf16.msrb.mxu1 %v3611_v31  ;;  %v4471_v31 = vor.u32 %v4823_v21, %v4468_v22  ;;  %v4803_v21 = vld [vmem:[#allocation8 + $0x7dc] sm:$0xf]  ;;  %v4388_v22 = vld [vmem:[#allocation8 + $0x7ec] sm:$0xf0] }
 0x140   :  { %2709 = vmatpush.bf16.msrb.mxu2 %v3771_v28  ;;  %2672 = vmatpush.bf16.msra.mxu3 %v4367_v34  ;;  %v4131_v28 = vor.u32 %v4738_v18, %v4128_v19  ;;  %v4718_v18 = vld [vmem:[#allocation8 + $0x534] sm:$0xf]  ;;  %v4048_v19 = vld [vmem:[#allocation8 + $0x544] sm:$0xf0]  ;;  %v4391_v37 = vor.u32 %v4803_v21, %v4388_v22  ;;  %v3834_v21 = vld [vmem:[#allocation8 + $0x380] sm:$0xf] }
 0x141   :  { %2685 = vmatpush.bf16.msrb.mxu0 %v3411_v38  ;;  %v5380_v38 = vld [vmem:[#allocation10] sm:$0x1f]  ;;  %v4666_v22 = vld [vmem:[#allocation8 + $0x390] sm:$0xf0] }
 0x143   :  { %2697 = vmatpush.bf16.msrb.mxu1 %v3591_v48  ;;  %v940_v48 = vperm.slane %v5380_v38, 0 }
 0x144   :  { %2710 = vmatpush.bf16.msrb.mxu2 %v3751_v42  ;;  %2673 = vmatpush.bf16.msra.mxu3 %v4347_v53  ;;  %v2428_v34 = vpop.f32.mrf.mxu0  ;;  %v4111_v42 = vor.u32 %v4733_v32, %v4108_v33  ;;  %v4813_v53 = vld [vmem:[#allocation8 + $0x82c] sm:$0xf]  ;;  %v4051_v32 = vor.u32 %v4718_v18, %v4048_v19  ;;  %v3868_v33 = vld [vmem:[#allocation8 + $0x3dc] sm:$0xf0]  ;;  %v4706_v19 = vld [vmem:[#allocation8 + $0x4d0] sm:$0xf0] }
 0x145   :  { %2686 = vmatpush.bf16.msrb.mxu0 %v3391_v56  ;;  %v4773_v56 = vld [vmem:[#allocation8 + $0x6ec] sm:$0xf]  ;;  %v3994_v18 = vld [vmem:[#allocation8 + $0x4c0] sm:$0xf] }
 0x147   :  { %2698 = vmatpush.bf16.msrb.mxu1 %v3571_v1  ;;  %2674 = vmatmul.bf16.vlgmr.msra.gmra.mxu3 %v5363_v15  ;;  %v4431_v1 = vor.u32 %v4813_v53, %v4428_v54  ;;  %v3514_v54 = vld [vmem:[#allocation8 + $0x100] sm:$0xf] }
 0x148   :  { %2718 = vmatpush.bf16.msrb.mxu3 %v4011_v57  ;;  %2711 = vmatpush.bf16.msrb.mxu2 %v3731_v59  ;;  %v4268_v57 = vld [vmem:[#allocation8 + $0x6fc] sm:$0xf0]  ;;  %v4683_v59 = vld [vmem:[#allocation8 + $0x41c] sm:$0xf] }
 0x149   :  { %2731 = vmatpush.bf16.msra.mxu0 %v4171_v41  ;;  %v2415_v58 = vpop.f32.mrf.mxu3  ;;  %v4091_v41 = vor.u32 %v4728_v49, %v4088_v50  ;;  %v4271_v5 = vor.u32 %v4773_v56, %v4268_v57  ;;  %v3911_v9 = vor.u32 %v4683_v59, %v3908_v60  ;;  %v4758_v49 = vld [vmem:[#allocation8 + $0x674] sm:$0xf]  ;;  %v4208_v50 = vld [vmem:[#allocation8 + $0x684] sm:$0xf0]  ;;  %v4753_v60 = vld [vmem:[#allocation8 + $0x64c] sm:$0xf] }
 0x14a   :  { %2687 = vmatmul.bf16.vlgmr.msrb.gmra.mxu0 %v5341_v61  ;;  %v2416_v63 = vadd.f32 %v2415_v58, %v940_v48  ;;  %v3871_v48 = vor.u32 %v4673_v29, %v3868_v33  ;;  %v4586_v57 = vld [vmem:[#allocation8 + $0x110] sm:$0xf0]  ;;  %v3674_v58 = vld [vmem:[#allocation8 + $0x240] sm:$0xf]  ;;  %v4211_v59 = vor.u32 %v4758_v49, %v4208_v50  ;;  %v3634_v29 = vld [vmem:[#allocation8 + $0x1f0] sm:$0xf]  ;;  %v3835_v33 = vor.u32 %v4666_v22, %v3834_v21 }
 0x14b   :  { %2699 = vmatpush.bf16.msrb.mxu1 %v3551_v16  ;;  %v2441_v0 = vpop.f32.mrf.mxu1  ;;  %v3954_v50 = vld [vmem:[#allocation8 + $0x470] sm:$0xf]  ;;  %v4646_v21 = vld [vmem:[#allocation8 + $0x2f0] sm:$0xf0] }
 0x14c   :  { %2719 = vmatpush.bf16.msrb.mxu3 %v3991_v8  ;;  %2712 = vmatpush.bf16.msrb.mxu2 %v3711_v12  ;;  %v2430_v4 = vpop.f32.mrf.mxu0  ;;  %v2429_v8 = vadd.f32 %v2428_v34, %v2416_v63  ;;  %v4071_v12 = vor.u32 %v4723_v2, %v4068_v3  ;;  %v4713_v34 = vld [vmem:[#allocation8 + $0x50c] sm:$0xf]  ;;  %v4188_v2 = vld [vmem:[#allocation8 + $0x65c] sm:$0xf0]  ;;  %v4014_v3 = vld [vmem:[#allocation8 + $0x4e8] sm:$0xf] }
 0x14d   :  { %2732 = vmatpush.bf16.msra.mxu0 %v4151_v11  ;;  %v4248_v11 = vld [vmem:[#allocation8 + $0x6d4] sm:$0xf0]  ;;  %v4793_v63 = vld [vmem:[#allocation8 + $0x78c] sm:$0xf]  ;;  %v4711_v4 = vld [vmem:[#allocation8 + $0x4f8] sm:$0xf0] }
 0x14e   :  { %2700 = vmatmul.bf16.vlgmr.msrb.gmra.mxu1 %v5343_v62  ;;  %v2442_v16 = vadd.f32 %v2441_v0, %v2429_v8  ;;  %v4348_v0 = vld [vmem:[#allocation8 + $0x79c] sm:$0xf0]  ;;  %v4015_v13 = vor.u32 %v4711_v4, %v4014_v3  ;;  %v3934_v3 = vld [vmem:[#allocation8 + $0x448] sm:$0xf]  ;;  %v4691_v4 = vld [vmem:[#allocation8 + $0x458] sm:$0xf0] }
 0x14f   :  { %2744 = vmatpush.bf16.msra.mxu1 %v4331_v20  ;;  %2713 = vmatmul.bf16.vlgmr.msrb.gmra.mxu2 %v5347_v24  ;;  %v4251_v20 = vor.u32 %v4768_v10, %v4248_v11  ;;  %v3494_v10 = vld [vmem:[#allocation8 + $0xd8] sm:$0xf]  ;;  %v4581_v11 = vld [vmem:[#allocation8 + $0xe8] sm:$0xf0]  ;;  %v3394_v22 = vld [vmem:[#allocation8 + $0x10] sm:$0xf] }
 0x150   :  { %2757 = vmatpush.bf16.msra.mxu2 %v4491_v17  ;;  %2720 = vmatpush.bf16.msrb.mxu3 %v3971_v23  ;;  %v4411_v17 = vor.u32 %v4808_v6, %v4408_v7  ;;  %v3854_v6 = vld [vmem:[#allocation8 + $0x3a8] sm:$0xf]  ;;  %v4671_v7 = vld [vmem:[#allocation8 + $0x3b8] sm:$0xf0] }
 0x151   :  { %2733 = vmatpush.bf16.msra.mxu0 %v4131_v28  ;;  %v4228_v28 = vld [vmem:[#allocation8 + $0x6ac] sm:$0xf0] }
 0x152   :  { %v2454_v23 = vpop.f32.mrf.mxu2 }
 0x153   :  { %2745 = vmatpush.bf16.msra.mxu1 %v4311_v35  ;;  %v5385_v30 = vadd.f32 %v2454_v23, %v2442_v16  ;;  %v4028_v35 = vld [vmem:[#allocation8 + $0x51c] sm:$0xf0]  ;;  %v2443_v36 = vpop.f32.mrf.mxu1  ;;  %v4621_v16 = vld [vmem:[#allocation8 + $0x228] sm:$0xf0] }
 0x154   :  { %2758 = vmatpush.bf16.msra.mxu2 %v4471_v31  ;;  %2721 = vmatpush.bf16.msrb.mxu3 %v3951_v47  ;;  %v2417_v31 = vpop.f32.mrf.mxu3  ;;  %v3534_v47 = vld [vmem:[#allocation8 + $0x128] sm:$0xf]  ;;  %v3655_v23 = vor.u32 %v4621_v16, %v3654_v14  ;;  %v4601_v14 = vld [vmem:[#allocation8 + $0x188] sm:$0xf0] }
 0x155   :  { %2734 = vmatpush.bf16.msra.mxu0 %v4111_v42  ;;  %v4231_v42 = vor.u32 %v4763_v27, %v4228_v28  ;;  %v3535_v53 = vor.u32 %v4591_v39, %v3534_v47  ;;  %v4576_v27 = vld [vmem:[#allocation8 + $0xc0] sm:$0xf0]  ;;  %v3995_v28 = vor.u32 %v4706_v19, %v3994_v18  ;;  %v3814_v47 = vld [vmem:[#allocation8 + $0x358] sm:$0xf]  ;;  %v4661_v39 = vld [vmem:[#allocation8 + $0x368] sm:$0xf0] }
 0x156   :  { %v4616_v31 = vld [vmem:[#allocation8 + $0x200] sm:$0xf0]  ;;  %v3815_v49 = vor.u32 %v4661_v39, %v3814_v47  ;;  %v4686_v18 = vld [vmem:[#allocation8 + $0x430] sm:$0xf0]  ;;  %v4791_v39 = vld [vmem:[#allocation8 + $0x778] sm:$0xf0] }
 0x157   :  { %2746 = vmatpush.bf16.msra.mxu1 %v4291_v52  ;;  %v4031_v52 = vor.u32 %v4713_v34, %v4028_v35  ;;  %v3974_v34 = vld [vmem:[#allocation8 + $0x498] sm:$0xf]  ;;  %v4701_v35 = vld [vmem:[#allocation8 + $0x4a8] sm:$0xf0] }
 0x158   :  { %2759 = vmatpush.bf16.msra.mxu2 %v4451_v46  ;;  %2722 = vmatpush.bf16.msrb.mxu3 %v3931_v55  ;;  %v4368_v46 = vld [vmem:[#allocation8 + $0x7c4] sm:$0xf0]  ;;  %v3695_v55 = vor.u32 %v4631_v43, %v3694_v40  ;;  %v3635_v40 = vor.u32 %v4616_v31, %v3634_v29  ;;  %v4571_v43 = vld [vmem:[#allocation8 + $0x98] sm:$0xf0] }
 0x159   :  { %2735 = vmatpush.bf16.msra.mxu0 %v4091_v41  ;;  %v4371_v56 = vor.u32 %v4798_v44, %v4368_v46  ;;  %v4626_v41 = vld [vmem:[#allocation8 + $0x250] sm:$0xf0]  ;;  %v3975_v44 = vor.u32 %v4701_v35, %v3974_v34  ;;  %v3614_v46 = vld [vmem:[#allocation8 + $0x1c8] sm:$0xf]  ;;  %v4751_v34 = vld [vmem:[#allocation8 + $0x638] sm:$0xf0] }
 0x15a   :  { %v3675_v8 = vor.u32 %v4626_v41, %v3674_v58  ;;  %v4566_v58 = vld [vmem:[#allocation8 + $0x70] sm:$0xf0]  ;;  %v4334_v35 = vld [vmem:[#allocation8 + $0x768] sm:$0xf] }
 0x15b   :  { %2747 = vmatpush.bf16.msra.mxu1 %v4271_v5  ;;  %v3515_v5 = vor.u32 %v4586_v57, %v3514_v54  ;;  %v3794_v54 = vld [vmem:[#allocation8 + $0x330] sm:$0xf]  ;;  %v3434_v57 = vld [vmem:[#allocation8 + $0x60] sm:$0xf] }
 0x15c   :  { %2760 = vmatpush.bf16.msra.mxu2 %v4431_v1  ;;  %2723 = vmatpush.bf16.msrb.mxu3 %v3911_v9  ;;  %v2456_v1 = vpop.f32.mrf.mxu2  ;;  %v4351_v9 = vor.u32 %v4793_v63, %v4348_v0  ;;  %v4606_v63 = vld [vmem:[#allocation8 + $0x1b0] sm:$0xf0] }
 0x15d   :  { %2736 = vmatpush.bf16.msra.mxu0 %v4071_v12  ;;  %v4191_v12 = vor.u32 %v4753_v60, %v4188_v2  ;;  %v3594_v60 = vld [vmem:[#allocation8 + $0x1a0] sm:$0xf] }
 0x15f   :  { %2748 = vmatpush.bf16.msra.mxu1 %v4251_v20  ;;  %v3495_v20 = vor.u32 %v4581_v11, %v3494_v10  ;;  %v3414_v10 = vld [vmem:[#allocation8 + $0x38] sm:$0xf]  ;;  %v4561_v11 = vld [vmem:[#allocation8 + $0x48] sm:$0xf0] }
 0x160   :  { %2761 = vmatpush.bf16.msra.mxu2 %v4411_v17  ;;  %2724 = vmatpush.bf16.msrb.mxu3 %v3891_v26  ;;  %v3855_v17 = vor.u32 %v4671_v7, %v3854_v6  ;;  %v3474_v26 = vld [vmem:[#allocation8 + $0xb0] sm:$0xf]  ;;  %v3435_v6 = vor.u32 %v4566_v58, %v3434_v57  ;;  %v3774_v7 = vld [vmem:[#allocation8 + $0x308] sm:$0xf]  ;;  %v3415_v19 = vor.u32 %v4561_v11, %v3414_v10  ;;  %v4314_v57 = vld [vmem:[#allocation8 + $0x740] sm:$0xf] }
 0x161   :  { %2737 = vmatpush.bf16.msra.mxu0 %v4051_v32  ;;  %v4134_v10 = vld [vmem:[#allocation8 + $0x5d8] sm:$0xf]  ;;  %v4741_v11 = vld [vmem:[#allocation8 + $0x5e8] sm:$0xf0] }
 0x163   :  { %2749 = vmatpush.bf16.msra.mxu1 %v4231_v42  ;;  %v3454_v42 = vld [vmem:[#allocation8 + $0x88] sm:$0xf] }
 0x164   :  { %2762 = vmatpush.bf16.msra.mxu2 %v4391_v37  ;;  %2725 = vmatpush.bf16.msrb.mxu3 %v3871_v48  ;;  %v5389_v32 = vpop.f32.mrf.mxu2  ;;  %v5392_v36 = vpop.f32.mrf.mxu0  ;;  %v3475_v37 = vor.u32 %v4576_v27, %v3474_v26  ;;  %v4611_v48 = vld [vmem:[#allocation8 + $0x1d8] sm:$0xf0]  ;;  %v4556_v26 = vld [vmem:[#allocation8 + $0x20] sm:$0xf0]  ;;  %v3554_v27 = vld [vmem:[#allocation8 + $0x150] sm:$0xf] }
 0x165   :  { %2738 = vmatpush.bf16.msra.mxu0 %v4031_v52  ;;  %v4696_v52 = vld [vmem:[#allocation8 + $0x480] sm:$0xf0] }
 0x167   :  { %2750 = vmatpush.bf16.msra.mxu1 %v4211_v59  ;;  %2726 = vmatmul.bf16.vlgmr.msrb.gmra.mxu3 %v5349_v25  ;;  %v3955_v59 = vor.u32 %v4696_v52, %v3954_v50 }
 0x168   :  { %2770 = vmatpush.bf16.msra.mxu3 %v3535_v53  ;;  %2763 = vmatpush.bf16.msra.mxu2 %v4371_v56  ;;  %v3455_v53 = vor.u32 %v4571_v43, %v3454_v42  ;;  %v3615_v56 = vor.u32 %v4611_v48, %v3614_v46  ;;  %v4681_v42 = vld [vmem:[#allocation8 + $0x408] sm:$0xf0]  ;;  %v3734_v46 = vld [vmem:[#allocation8 + $0x2b8] sm:$0xf] }
 0x169   :  { %2783 = vmatpush.bf16.msrb.mxu0 %v3695_v55  ;;  %v4656_v55 = vld [vmem:[#allocation8 + $0x340] sm:$0xf0]  ;;  %v5395_v41 = vpop.f32.mrf.mxu3  ;;  %v4641_v48 = vld [vmem:[#allocation8 + $0x2c8] sm:$0xf0] }
 0x16a   :  { %2739 = vmatmul.bf16.vlgmr.msra.gmra.mxu0 %v5357_v45  ;;  %v3795_v2 = vor.u32 %v4656_v55, %v3794_v54  ;;  %v4154_v55 = vld [vmem:[#allocation8 + $0x600] sm:$0xf]  ;;  %v3735_v58 = vor.u32 %v4641_v48, %v3734_v46  ;;  %v4731_v46 = vld [vmem:[#allocation8 + $0x598] sm:$0xf0] }
 0x16b   :  { %2751 = vmatpush.bf16.msra.mxu1 %v4191_v12  ;;  %v5397_v0 = vpop.f32.mrf.mxu1  ;;  %v3935_v12 = vor.u32 %v4691_v4, %v3934_v3  ;;  %v4998_v3 = vld [vmem:[#allocation11 + $0x38] sm:$0xff]  }
 0x16c   :  { %2771 = vmatpush.bf16.msra.mxu3 %v3515_v5  ;;  %2764 = vmatpush.bf16.msra.mxu2 %v4351_v9  ;;  %v2508_v1 = vpop.f32.mrf.mxu2  ;;  %v2482_v5 = vpop.f32.mrf.mxu0  ;;  %v3595_v9 = vor.u32 %v4606_v63, %v3594_v60  ;;  %v3874_v60 = vld [vmem:[#allocation8 + $0x3d0] sm:$0xf]  ;;  %v4676_v63 = vld [vmem:[#allocation8 + $0x3e0] sm:$0xf0] }
 0x16d   :  { %2784 = vmatpush.bf16.msrb.mxu0 %v3675_v8  ;;  %v4651_v8 = vld [vmem:[#allocation8 + $0x318] sm:$0xf0]  ;;  %v3714_v1 = vld [vmem:[#allocation8 + $0x290] sm:$0xf]  ;;  %v4494_v5 = vld [vmem:[#allocation8 + $0x8a8] sm:$0xf] }
 0x16e   :  { %2752 = vmatmul.bf16.vlgmr.msra.gmra.mxu1 %v5359_v51  ;;  %v3775_v16 = vor.u32 %v4651_v8, %v3774_v7 }
 0x16f   :  { %2796 = vmatpush.bf16.msrb.mxu1 %v3855_v17  ;;  %2765 = vmatmul.bf16.vlgmr.msra.gmra.mxu2 %v5363_v15  ;;  %v3914_v17 = vld [vmem:[#allocation8 + $0x420] sm:$0xf] }
 0x170   :  { %2809 = vmatpush.bf16.msrb.mxu2 %v4015_v13  ;;  %2772 = vmatpush.bf16.msra.mxu3 %v3495_v20  ;;  %v3574_v13 = vld [vmem:[#allocation8 + $0x178] sm:$0xf]  ;;  %v3754_v20 = vld [vmem:[#allocation8 + $0x2e0] sm:$0xf]  ;;  %v3915_v31 = vor.u32 %v4686_v18, %v3914_v17  ;;  %v4781_v17 = vld [vmem:[#allocation8 + $0x728] sm:$0xf0] }
 0x171   :  { %2785 = vmatpush.bf16.msrb.mxu0 %v3655_v23  ;;  %v3575_v23 = vor.u32 %v4601_v14, %v3574_v13  ;;  %v2469_v29 = vpop.f32.mrf.mxu3  ;;  %v3755_v47 = vor.u32 %v4646_v21, %v3754_v20  ;;  %v4863_v14 = vunpack.c.h.bf16 %v4998_v3  ;;  %v4135_v21 = vor.u32 %v4741_v11, %v4134_v10 }
 0x172   :  { %v4736_v29 = vld [vmem:[#allocation8 + $0x5c0] sm:$0xf0] }
 0x173   :  { %2797 = vmatpush.bf16.msrb.mxu1 %v3835_v33  ;;  %v4174_v33 = vld [vmem:[#allocation8 + $0x628] sm:$0xf] }
 0x174   :  { %2810 = vmatpush.bf16.msrb.mxu2 %v3995_v28  ;;  %2773 = vmatpush.bf16.msra.mxu3 %v3475_v37  ;;  %v4596_v28 = vld [vmem:[#allocation8 + $0x160] sm:$0xf0]  ;;  %v2495_v37 = vpop.f32.mrf.mxu1  ;;  %v5399_v43 = vpop.f32.mrf.mxu2  ;;  %v4175_v52 = vor.u32 %v4751_v34, %v4174_v33 }
 0x175   :  { %2786 = vmatpush.bf16.msrb.mxu0 %v3635_v40  ;;  %v3894_v40 = vld [vmem:[#allocation8 + $0x3f8] sm:$0xf]  ;;  %v3555_v50 = vor.u32 %v4596_v28, %v3554_v27  ;;  %v4114_v28 = vld [vmem:[#allocation8 + $0x5b0] sm:$0xf]  ;;  %v4776_v33 = vld [vmem:[#allocation8 + $0x700] sm:$0xf0] }
 0x176   :  { %v3895_v54 = vor.u32 %v4681_v42, %v3894_v40  ;;  %v4997_v27 = vld [vmem:[#allocation11 + $0x30] sm:$0xff]   ;;  %v4996_v42 = vld [vmem:[#allocation11 + $0x28] sm:$0xff]  }
 0x177   :  { %2798 = vmatpush.bf16.msrb.mxu1 %v3815_v49  ;;  %v5401_v49 = vpop.f32.mrf.mxu0  ;;  %v4859_v34 = vunpack.c.h.bf16 %v4997_v27  ;;  %v4454_v37 = vld [vmem:[#allocation8 + $0x858] sm:$0xf] }
 0x178   :  { %2811 = vmatpush.bf16.msrb.mxu2 %v3975_v44  ;;  %2774 = vmatpush.bf16.msra.mxu3 %v3455_v53  ;;  %v3395_v44 = vor.u32 %v4556_v26, %v3394_v22  ;;  %v4335_v53 = vor.u32 %v4791_v39, %v4334_v35  ;;  %v4474_v22 = vld [vmem:[#allocation8 + $0x880] sm:$0xf]  ;;  %v4115_v35 = vor.u32 %v4736_v29, %v4114_v28  ;;  %v4806_v28 = vld [vmem:[#allocation8 + $0x7f0] sm:$0xf0] }
 0x179   :  { %2787 = vmatpush.bf16.msrb.mxu0 %v3615_v56  ;;  %v4746_v56 = vld [vmem:[#allocation8 + $0x610] sm:$0xf0]  ;;  %v5403_v7 = vpop.f32.mrf.mxu3 }
 0x17a   :  { %v4155_v4 = vor.u32 %v4746_v56, %v4154_v55  ;;  %v4855_v55 = vunpack.c.h.bf16 %v4996_v42 }
 0x17b   :  { %2799 = vmatpush.bf16.msrb.mxu1 %v3795_v2  ;;  %v4636_v2 = vld [vmem:[#allocation8 + $0x2a0] sm:$0xf0] }
 0x17c   :  { %2812 = vmatpush.bf16.msrb.mxu2 %v3955_v59  ;;  %2775 = vmatpush.bf16.msra.mxu3 %v3435_v6  ;;  %v4786_v59 = vld [vmem:[#allocation8 + $0x750] sm:$0xf0]  ;;  %v4831_v6 = vld [vmem:[#allocation8 + $0x8b8] sm:$0xf0]  ;;  %v3715_v13 = vor.u32 %v4636_v2, %v3714_v1  ;;  %v2560_v18 = vpop.f32.mrf.mxu2  ;;  %v4854_v1 = vunpack.c.l.bf16 %v4996_v42  ;;  %v4234_v2 = vld [vmem:[#allocation8 + $0x6a0] sm:$0xf] }
 0x17d   :  { %2788 = vmatpush.bf16.msrb.mxu0 %v3595_v9  ;;  %v4315_v8 = vor.u32 %v4786_v59, %v4314_v57  ;;  %v3875_v9 = vor.u32 %v4676_v63, %v3874_v60  ;;  %v4816_v57 = vld [vmem:[#allocation8 + $0x840] sm:$0xf0]  ;;  %v4074_v60 = vld [vmem:[#allocation8 + $0x560] sm:$0xf]  ;;  %v4726_v63 = vld [vmem:[#allocation8 + $0x570] sm:$0xf0] }
 0x17e   :  { %v4995_v59 = vld [vmem:[#allocation11 + $0x20] sm:$0xff]  }
 0x17f   :  { %2800 = vmatpush.bf16.msrb.mxu1 %v3775_v16  ;;  %v4294_v16 = vld [vmem:[#allocation8 + $0x718] sm:$0xf]  ;;  %v2534_v20 = vpop.f32.mrf.mxu0  ;;  %v4850_v18 = vunpack.c.l.bf16 %v4995_v59 }
 0x180   :  { %2813 = vmatpush.bf16.msrb.mxu2 %v3935_v12  ;;  %2776 = vmatpush.bf16.msra.mxu3 %v3415_v19  ;;  %v5405_v12 = vpop.f32.mrf.mxu1  ;;  %v4495_v19 = vor.u32 %v4831_v6, %v4494_v5  ;;  %v4295_v26 = vor.u32 %v4781_v17, %v4294_v16  ;;  %v4851_v5 = vunpack.c.h.bf16 %v4995_v59  ;;  %v4075_v6 = vor.u32 %v4726_v63, %v4074_v60  ;;  %v4721_v16 = vld [vmem:[#allocation8 + $0x548] sm:$0xf0]  ;;  %v5005_v60 = vld [vmem:[#allocation11 + $0x70] sm:$0xff]   ;;  %v4354_v63 = vld [vmem:[#allocation8 + $0x790] sm:$0xf] }
 0x181   :  { %2789 = vmatpush.bf16.msrb.mxu0 %v3575_v23  ;;  %v4826_v23 = vld [vmem:[#allocation8 + $0x890] sm:$0xf0]  ;;  %v2521_v39 = vpop.f32.mrf.mxu3  ;;  %v4761_v20 = vld [vmem:[#allocation8 + $0x688] sm:$0xf0] }
 0x183   :  { %2801 = vmatpush.bf16.msrb.mxu1 %v3755_v47  ;;  %v4821_v47 = vld [vmem:[#allocation8 + $0x868] sm:$0xf0] }
 0x184   :  { %2814 = vmatpush.bf16.msrb.mxu2 %v3915_v31  ;;  %2777 = vmatpush.bf16.msra.mxu3 %v3395_v44  ;;  %v4274_v31 = vld [vmem:[#allocation8 + $0x6f0] sm:$0xf]  ;;  %v4094_v44 = vld [vmem:[#allocation8 + $0x588] sm:$0xf] }
 0x185   :  { %2790 = vmatpush.bf16.msrb.mxu0 %v3555_v50  ;;  %v4275_v40 = vor.u32 %v4776_v33, %v4274_v31  ;;  %v4858_v50 = vunpack.c.l.bf16 %v4997_v27  ;;  %v4095_v56 = vor.u32 %v4731_v46, %v4094_v44  ;;  %v4394_v27 = vld [vmem:[#allocation8 + $0x7e0] sm:$0xf]  ;;  %v4034_v31 = vld [vmem:[#allocation8 + $0x510] sm:$0xf]  ;;  %v4716_v33 = vld [vmem:[#allocation8 + $0x520] sm:$0xf0] }
 0x186   :  { %v4395_v39 = vor.u32 %v4806_v28, %v4394_v27  ;;  %v4035_v44 = vor.u32 %v4716_v33, %v4034_v31  ;;  %v4374_v46 = vld [vmem:[#allocation8 + $0x7b8] sm:$0xf] }
 0x187   :  { %2802 = vmatpush.bf16.msrb.mxu1 %v3735_v58  ;;  %2778 = vmatmul.bf16.vlgmr.msra.gmra.mxu3 %v5341_v61  ;;  %v4862_v61 = vunpack.c.l.bf16 %v4998_v3  ;;  %v4766_v3 = vld [vmem:[#allocation8 + $0x6b0] sm:$0xf0] }
 0x188   :  { %2822 = vmatpush.bf16.msrb.mxu3 %v4175_v52  ;;  %2815 = vmatpush.bf16.msrb.mxu2 %v3895_v54  ;;  %v2547_v48 = vpop.f32.mrf.mxu1  ;;  %v4254_v52 = vld [vmem:[#allocation8 + $0x6c8] sm:$0xf]  ;;  %v5411_v54 = vpop.f32.mrf.mxu0  ;;  %v4235_v11 = vor.u32 %v4766_v3, %v4234_v2 }
 0x189   :  { %2835 = vmatpush.bf16.msra.mxu0 %v4335_v53  ;;  %v4771_v53 = vld [vmem:[#allocation8 + $0x6d8] sm:$0xf0]  ;;  %v4801_v48 = vld [vmem:[#allocation8 + $0x7c8] sm:$0xf0] }
 0x18a   :  { %2791 = vmatmul.bf16.vlgmr.msrb.gmra.mxu0 %v5343_v62  ;;  %v4475_v62 = vor.u32 %v4826_v23, %v4474_v22  ;;  %v4255_v58 = vor.u32 %v4771_v53, %v4254_v52  ;;  %v5413_v10 = vpop.f32.mrf.mxu3 }
 0x18b   :  { %2803 = vmatpush.bf16.msrb.mxu1 %v3715_v13  ;;  %v4994_v13 = vld [vmem:[#allocation11 + $0x18] sm:$0xff]  }
 0x18c   :  { %2823 = vmatpush.bf16.msrb.mxu3 %v4155_v4  ;;  %2816 = vmatpush.bf16.msrb.mxu2 %v3875_v9  ;;  %v4811_v9 = vld [vmem:[#allocation8 + $0x818] sm:$0xf0]  ;;  %v4847_v23 = vunpack.c.h.bf16 %v4994_v13 }
 0x18d   :  { %2836 = vmatpush.bf16.msra.mxu0 %v4315_v8  ;;  %v4414_v8 = vld [vmem:[#allocation8 + $0x808] sm:$0xf] }
 0x18e   :  { %2804 = vmatmul.bf16.vlgmr.msrb.gmra.mxu1 %v5347_v24  ;;  %v4434_v24 = vld [vmem:[#allocation8 + $0x830] sm:$0xf] }
 0x18f   :  { %2848 = vmatpush.bf16.msra.mxu1 %v4495_v19  ;;  %2817 = vmatmul.bf16.vlgmr.msrb.gmra.mxu2 %v5349_v25  ;;  %v4455_v25 = vor.u32 %v4821_v47, %v4454_v37  ;;  %v4435_v4 = vor.u32 %v4816_v57, %v4434_v24  ;;  %v4214_v19 = vld [vmem:[#allocation8 + $0x678] sm:$0xf]  ;;  %v5006_v37 = vld [vmem:[#allocation11 + $0x78] sm:$0xff]  }
 0x190   :  { %3030 = vmatpush.msra.mxu2 %v4863_v14  ;;  %2824 = vmatpush.bf16.msrb.mxu3 %v4135_v21  ;;  %v4054_v14 = vld [vmem:[#allocation8 + $0x538] sm:$0xf]  ;;  %v5415_v17 = vpop.f32.mrf.mxu1  ;;  %v4415_v21 = vor.u32 %v4811_v9, %v4414_v8  ;;  %v2586_v22 = vpop.f32.mrf.mxu0  ;;  %v4215_v29 = vor.u32 %v4761_v20, %v4214_v19  ;;  %v4891_v8 = vunpack.c.h.bf16 %v5005_v60  ;;  %v5012_v20 = vld [vmem:[#allocation11 + $0xa8] sm:$0xff]  }
 0x191   :  { %2837 = vmatpush.bf16.msra.mxu0 %v4295_v26  ;;  %v4055_v26 = vor.u32 %v4721_v16, %v4054_v14  ;;  %v5003_v22 = vld [vmem:[#allocation11 + $0x60] sm:$0xff]   ;;  %v4919_v27 = vunpack.c.h.bf16 %v5012_v20 }
 0x192   :  { %3031 = vmatpush.msra.mxu2 %v4862_v61  ;;  %v4993_v61 = vld [vmem:[#allocation11 + $0x10] sm:$0xff]   ;;  %v5417_v47 = vpop.f32.mrf.mxu2  ;;  %v2573_v52 = vpop.f32.mrf.mxu3  ;;  %v4883_v28 = vunpack.c.h.bf16 %v5003_v22  ;;  %v4882_v33 = vunpack.c.l.bf16 %v5003_v22 }
 0x193   :  { %2849 = vmatpush.bf16.msra.mxu1 %v4475_v62  ;;  %v4846_v62 = vunpack.c.l.bf16 %v4994_v13  ;;  %v4843_v42 = vunpack.c.h.bf16 %v4993_v61  ;;  %v4842_v24 = vunpack.c.l.bf16 %v4993_v61  ;;  %v5004_v13 = vld [vmem:[#allocation11 + $0x68] sm:$0xff]   ;;  %v5002_v61 = vld [vmem:[#allocation11 + $0x58] sm:$0xff]  }
 0x194   :  { %3032 = vmatpush.msra.mxu2 %v4859_v34  ;;  %2825 = vmatpush.bf16.msrb.mxu3 %v4115_v35  ;;  %v4194_v34 = vld [vmem:[#allocation8 + $0x650] sm:$0xf]  ;;  %v4756_v35 = vld [vmem:[#allocation8 + $0x660] sm:$0xf0] }
 0x195   :  { %2838 = vmatpush.bf16.msra.mxu0 %v4275_v40  ;;  %v5014_v40 = vld [vmem:[#allocation11 + $0xb8] sm:$0xff]   ;;  %v4195_v53 = vor.u32 %v4756_v35, %v4194_v34 }
 0x196   :  { %3033 = vmatpush.msra.mxu2 %v4858_v50  ;;  %v2468_v50 = vadd.f32 %v5395_v41, %v5385_v30  ;;  %v4927_v57 = vunpack.c.h.bf16 %v5014_v40  ;;  %v4894_v30 = vunpack.c.l.bf16 %v5006_v37  ;;  %v4833_v41 = vld [vmem:[#allocation11] sm:$0xff]   ;;  %v4926_v3 = vunpack.c.l.bf16 %v5014_v40  ;;  %v5010_v35 = vld [vmem:[#allocation11 + $0x98] sm:$0xff]  }
 0x197   :  { %2850 = vmatpush.bf16.msra.mxu1 %v4455_v25  ;;  %v4895_v25 = vunpack.c.h.bf16 %v5006_v37  ;;  %v4834_v19 = vunpack.c.l.bf16 %v4833_v41  ;;  %v4910_v52 = vunpack.c.l.bf16 %v5010_v35 }
 0x198   :  { %3034 = vmatpush.msra.mxu2 %v4855_v55  ;;  %2826 = vmatpush.bf16.msrb.mxu3 %v4095_v56  ;;  %v4992_v55 = vld [vmem:[#allocation11 + $0x8] sm:$0xff]   ;;  %v2599_v56 = vpop.f32.mrf.mxu1  ;;  %v2481_v2 = vadd.f32 %v5392_v36, %v2468_v50  ;;  %v4835_v36 = vunpack.c.h.bf16 %v4833_v41 }
 0x199   :  { %2839 = vmatpush.bf16.msra.mxu0 %v4255_v58  ;;  %v4375_v58 = vor.u32 %v4801_v48, %v4374_v46  ;;  %v4839_v59 = vunpack.c.h.bf16 %v4992_v55  ;;  %v5009_v48 = vld [vmem:[#allocation11 + $0x90] sm:$0xff]   ;;  %v5000_v50 = vld [vmem:[#allocation11 + $0x48] sm:$0xff]  }
 0x19a   :  { %3035 = vmatpush.msra.mxu2 %v4854_v1  ;;  %v4796_v1 = vld [vmem:[#allocation8 + $0x7a0] sm:$0xf0]  ;;  %v2494_v16 = vadd.f32 %v5397_v0, %v2481_v2  ;;  %v4907_v56 = vunpack.c.h.bf16 %v5009_v48  ;;  %v4870_v41 = vunpack.c.l.bf16 %v5000_v50 }
 0x19b   :  { %2851 = vmatpush.bf16.msra.mxu1 %v4435_v4  ;;  %v5013_v4 = vld [vmem:[#allocation11 + $0xb0] sm:$0xff]   ;;  %v4355_v9 = vor.u32 %v4796_v1, %v4354_v63  ;;  %v4906_v63 = vunpack.c.l.bf16 %v5009_v48 }
 0x19c   :  { %3036 = vmatpush.msra.mxu2 %v4851_v5  ;;  %2827 = vmatpush.bf16.msrb.mxu3 %v4075_v6  ;;  %v4838_v5 = vunpack.c.l.bf16 %v4992_v55  ;;  %v2612_v6 = vpop.f32.mrf.mxu2  ;;  %v4923_v14 = vunpack.c.h.bf16 %v5013_v4 }
 0x19d   :  { %2840 = vmatpush.bf16.msra.mxu0 %v4235_v11  ;;  %v941_v11 = vperm.slane %v5380_v38, 1 }
 0x19e   :  { %3037 = vmatpush.msra.mxu2 %v4850_v18  ;;  %v4890_v18 = vunpack.c.l.bf16 %v5005_v60  ;;  %v4999_v60 = vld [vmem:[#allocation11 + $0x40] sm:$0xff]  }
 0x19f   :  { %2852 = vmatpush.bf16.msra.mxu1 %v4415_v21  ;;  %v2507_v21 = vadd.f32 %v5389_v32, %v941_v11  ;;  %v4918_v32 = vunpack.c.l.bf16 %v5012_v20 }
 0x1a0   :  { %3038 = vmatpush.msra.mxu2 %v4847_v23  ;;  %2828 = vmatpush.bf16.msrb.mxu3 %v4055_v26  ;;  %v2861_v23 = vmax.f32 %v2494_v16, 0.0  ;;  %v4886_v26 = vunpack.c.l.bf16 %v5004_v13 }
 0x1a1   :  { %2841 = vmatpush.bf16.msra.mxu0 %v4215_v29  ;;  %v2520_v0 = vadd.f32 %v5403_v7, %v2507_v21  ;;  %v5011_v29 = vld [vmem:[#allocation11 + $0xa0] sm:$0xff]   ;;  %v4879_v7 = vunpack.c.h.bf16 %v5002_v61 }
 0x1a2   :  { %3039 = vmatpush.msra.mxu2 %v4846_v62  ;;  %v4915_v34 = vunpack.c.h.bf16 %v5011_v29  ;;  %v4914_v37 = vunpack.c.l.bf16 %v5011_v29  ;;  %v5019_v21 = vld [vmem:[#allocation11 + $0xe0] sm:$0xff]  }
 0x1a3   :  { %2853 = vmatpush.bf16.msra.mxu1 %v4395_v39  ;;  %v2533_v62 = vadd.f32 %v5401_v49, %v2520_v0  ;;  %v4878_v39 = vunpack.c.l.bf16 %v5002_v61  ;;  %v5017_v61 = vld [vmem:[#allocation11 + $0xd0] sm:$0xff]  }
 0x1a4   :  { %3040 = vmatpush.msra.mxu2 %v4843_v42  ;;  %2829 = vmatpush.bf16.msrb.mxu3 %v4035_v44  ;;  %v4911_v44 = vunpack.c.h.bf16 %v5010_v35 }
 0x1a5   :  { %2842 = vmatpush.bf16.msra.mxu0 %v4195_v53  ;;  %v2546_v40 = vadd.f32 %v5405_v12, %v2533_v62  ;;  %v4871_v12 = vunpack.c.h.bf16 %v5000_v50  ;;  %v4938_v62 = vunpack.c.l.bf16 %v5017_v61 }
 0x1a6   :  { %3041 = vmatpush.msra.mxu2 %v4842_v24  ;;  %v5008_v24 = vld [vmem:[#allocation11 + $0x88] sm:$0xff]  }
 0x1a7   :  { %2854 = vmatpush.bf16.msra.mxu1 %v4375_v58  ;;  %2830 = vmatmul.bf16.vlgmr.msrb.gmra.mxu3 %v5357_v45  ;;  %v4887_v45 = vunpack.c.h.bf16 %v5004_v13  ;;  %v5429_v31 = vpop.f32.mrf.mxu0  ;;  %v2559_v55 = vadd.f32 %v5399_v43, %v2546_v40  ;;  %v4902_v11 = vunpack.c.l.bf16 %v5008_v24 }
 0x1a8   :  { %3050 = vmatpush.msra.mxu3 %v4895_v25  ;;  %3042 = vmatpush.msra.mxu2 %v4839_v59 }
 0x1a9   :  { %3070 = vmatpush.msrb.mxu0 %v4927_v57  ;;  %v5022_v57 = vld [vmem:[#allocation11 + $0xf8] sm:$0xff]   ;;  %v2572_v58 = vadd.f32 %v5413_v10, %v2559_v55  ;;  %v5007_v10 = vld [vmem:[#allocation11 + $0x80] sm:$0xff]  }
 0x1aa   :  { %2843 = vmatmul.bf16.vlgmr.msra.gmra.mxu0 %v5359_v51  ;;  %3051 = vmatpush.msra.mxu3 %v4894_v30  ;;  %v4922_v51 = vunpack.c.l.bf16 %v5013_v4  ;;  %v5433_v42 = vpop.f32.mrf.mxu3  ;;  %v4959_v1 = vunpack.c.h.bf16 %v5022_v57  ;;  %v4958_v2 = vunpack.c.l.bf16 %v5022_v57  ;;  %v5021_v30 = vld [vmem:[#allocation11 + $0xf0] sm:$0xff]   ;;  %v4903_v4 = vunpack.c.h.bf16 %v5008_v24 }
 0x1ab   :  { %3071 = vmatpush.msrb.mxu0 %v4926_v3  ;;  %3043 = vmatpush.msra.mxu2 %v4838_v5  ;;  %v5435_v46 = vpop.f32.mrf.mxu1  ;;  %v942_v3 = vperm.slane %v5380_v38, 2  ;;  %v4955_v5 = vunpack.c.h.bf16 %v5021_v30  ;;  %v4954_v13 = vunpack.c.l.bf16 %v5021_v30  ;;  %v4899_v16 = vunpack.c.h.bf16 %v5007_v10 }
 0x1ac   :  { %3052 = vmatpush.msra.mxu3 %v4891_v8  ;;  %2855 = vmatpush.bf16.msra.mxu1 %v4355_v9  ;;  %v4867_v8 = vunpack.c.h.bf16 %v4999_v60  ;;  %v2585_v9 = vadd.f32 %v5411_v54, %v2572_v58  ;;  %v4898_v54 = vunpack.c.l.bf16 %v5007_v10 }
 0x1ad   :  { %3044 = vmatpush.msra.mxu2 %v4835_v36  ;;  %3072 = vmatpush.msrb.mxu0 %v4923_v14  ;;  %v4866_v36 = vunpack.c.l.bf16 %v4999_v60  ;;  %v5020_v14 = vld [vmem:[#allocation11 + $0xe8] sm:$0xff]   ;;  %v2598_v38 = vadd.f32 %v5415_v17, %v942_v3  ;;  %v4947_v17 = vunpack.c.h.bf16 %v5019_v21 }
 0x1ae   :  { %3053 = vmatpush.msra.mxu3 %v4890_v18  ;;  %v4951_v18 = vunpack.c.h.bf16 %v5020_v14  ;;  %v4950_v22 = vunpack.c.l.bf16 %v5020_v14 }
 0x1af   :  { %3045 = vmatpush.msra.mxu2 %v4834_v19  ;;  %2856 = vmatmul.bf16.vlgmr.msra.gmra.mxu1 %v5363_v15  ;;  %v5001_v15 = vld [vmem:[#allocation11 + $0x50] sm:$0xff]   ;;  %v2638_v53 = vpop.f32.mrf.mxu0  ;;  %v2862_v19 = vmax.f32 %v2585_v9, 0.0 }
 0x1b0   :  { %3046 = vmatmul.f32.vlgmr.msra.gmra.mxu2 %v2861_v23  ;;  %3054 = vmatpush.msra.mxu3 %v4887_v45  ;;  %v4875_v49 = vunpack.c.h.bf16 %v5001_v15  ;;  %v4874_v25 = vunpack.c.l.bf16 %v5001_v15  ;;  %v2611_v45 = vadd.f32 %v5417_v47, %v2598_v38  ;;  %v5018_v47 = vld [vmem:[#allocation11 + $0xd8] sm:$0xff]  }
 0x1b1   :  { %3073 = vmatpush.msrb.mxu0 %v4922_v51  ;;  %3090 = vmatpush.msrb.mxu1 %v4959_v1  ;;  %v4943_v0 = vunpack.c.h.bf16 %v5018_v47  ;;  %v5446_v53 = vld [vmem:[#allocation10] sm:$0x1f] }
 0x1b2   :  { %3055 = vmatpush.msra.mxu3 %v4886_v26  ;;  %v2662_v59 = vpop.f32.mrf.mxu2  ;;  %v2625_v43 = vpop.f32.mrf.mxu3  ;;  %v2624_v51 = vadd.f32 %v5433_v42, %v2611_v45  ;;  %v4946_v26 = vunpack.c.l.bf16 %v5019_v21  ;;  %v5015_v42 = vld [vmem:[#allocation11 + $0xc0] sm:$0xff]   ;;  %v5030_v1 = vld [vmem:[#allocation11 + $0x138] sm:$0xff]  }
 0x1b3   :  { %3074 = vmatpush.msrb.mxu0 %v4919_v27  ;;  %v2651_v6 = vpop.f32.mrf.mxu1  ;;  %3091 = vmatpush.msrb.mxu1 %v4958_v2  ;;  %v4942_v27 = vunpack.c.l.bf16 %v5018_v47  ;;  %v4991_v2 = vunpack.c.h.bf16 %v5030_v1  ;;  %v4990_v3 = vunpack.c.l.bf16 %v5030_v1  ;;  %v5029_v43 = vld [vmem:[#allocation11 + $0x130] sm:$0xff]  }
 0x1b4   :  { %3056 = vmatpush.msra.mxu3 %v4883_v28  ;;  %v2637_v23 = vadd.f32 %v5429_v31, %v2624_v51 }
 0x1b5   :  { %3075 = vmatpush.msrb.mxu0 %v4918_v32  ;;  %3092 = vmatpush.msrb.mxu1 %v4955_v5  ;;  %v4939_v32 = vunpack.c.h.bf16 %v5017_v61  ;;  %v4987_v5 = vunpack.c.h.bf16 %v5029_v43 }
 0x1b6   :  { %3057 = vmatpush.msra.mxu3 %v4882_v33  ;;  %v2650_v28 = vadd.f32 %v5435_v46, %v2637_v23  ;;  %3110 = vmatpush.msrb.mxu2 %v4991_v2 }
 0x1b7   :  { %3076 = vmatpush.msrb.mxu0 %v4915_v34  ;;  %3093 = vmatpush.msrb.mxu1 %v4954_v13 }
 0x1b8   :  { %3058 = vmatpush.msra.mxu3 %v4879_v7  ;;  %v2663_v33 = vadd.f32 %v2662_v59, %v2650_v28  ;;  %v5016_v7 = vld [vmem:[#allocation11 + $0xc8] sm:$0xff]   ;;  %3111 = vmatpush.msrb.mxu2 %v4990_v3 }
 0x1b9   :  { %3077 = vmatpush.msrb.mxu0 %v4914_v37  ;;  %3094 = vmatpush.msrb.mxu1 %v4951_v18  ;;  %v4935_v15 = vunpack.c.h.bf16 %v5016_v7  ;;  %v4934_v40 = vunpack.c.l.bf16 %v5016_v7 }
 0x1ba   :  { %3059 = vmatpush.msra.mxu3 %v4878_v39  ;;  %v2664_v20 = vpop.f32.mrf.mxu2  ;;  %3112 = vmatpush.msrb.mxu2 %v4987_v5 }
 0x1bb   :  { %3078 = vmatpush.msrb.mxu0 %v4911_v44  ;;  %3095 = vmatpush.msrb.mxu1 %v4950_v22  ;;  %v4931_v44 = vunpack.c.h.bf16 %v5015_v42 }
 0x1bc   :  { %3060 = vmatpush.msra.mxu3 %v4875_v49  ;;  %v4930_v49 = vunpack.c.l.bf16 %v5015_v42 }
 0x1bd   :  { %3079 = vmatpush.msrb.mxu0 %v4910_v52  ;;  %3096 = vmatpush.msrb.mxu1 %v4947_v17  ;;  %v5024_v17 = vld [vmem:[#allocation11 + $0x108] sm:$0xff]  }
 0x1be   :  { %3061 = vmatpush.msra.mxu3 %v4874_v25  ;;  %v943_v25 = vperm.slane %v5446_v53, 3  ;;  %v4967_v23 = vunpack.c.h.bf16 %v5024_v17 }
 0x1bf   :  { %3080 = vmatpush.msrb.mxu0 %v4907_v56  ;;  %3097 = vmatpush.msrb.mxu1 %v4946_v26 }
 0x1c0   :  { %3062 = vmatpush.msra.mxu3 %v4871_v12 }
 0x1c1   :  { %3081 = vmatpush.msrb.mxu0 %v4906_v63  ;;  %3098 = vmatpush.msrb.mxu1 %v4943_v0  ;;  %v4966_v0 = vunpack.c.l.bf16 %v5024_v17 }
 0x1c2   :  { %3063 = vmatpush.msra.mxu3 %v4870_v41 }
 0x1c3   :  { %3082 = vmatpush.msrb.mxu0 %v4903_v4  ;;  %3099 = vmatpush.msrb.mxu1 %v4942_v27  ;;  %v5023_v27 = vld [vmem:[#allocation11 + $0x100] sm:$0xff]  }
 0x1c4   :  { %3064 = vmatpush.msra.mxu3 %v4867_v8  ;;  %v4986_v8 = vunpack.c.l.bf16 %v5029_v43  ;;  %v4962_v61 = vunpack.c.l.bf16 %v5023_v27 }
 0x1c5   :  { %3083 = vmatpush.msrb.mxu0 %v4902_v11  ;;  %3100 = vmatpush.msrb.mxu1 %v4939_v32  ;;  %v5028_v11 = vld [vmem:[#allocation11 + $0x128] sm:$0xff]  }
 0x1c6   :  { %3065 = vmatpush.msra.mxu3 %v4866_v36  ;;  %v5027_v36 = vld [vmem:[#allocation11 + $0x120] sm:$0xff]   ;;  %3113 = vmatpush.msrb.mxu2 %v4986_v8  ;;  %v4983_v13 = vunpack.c.h.bf16 %v5028_v11  ;;  %v4982_v14 = vunpack.c.l.bf16 %v5028_v11 }
 0x1c7   :  { %3066 = vmatmul.f32.vlgmr.msra.gmra.mxu3 %v2862_v19  ;;  %3084 = vmatpush.msrb.mxu0 %v4899_v16  ;;  %v2688_v29 = vpop.f32.mrf.mxu0  ;;  %v4979_v16 = vunpack.c.h.bf16 %v5027_v36  ;;  %v4978_v18 = vunpack.c.l.bf16 %v5027_v36  ;;  %v5026_v19 = vld [vmem:[#allocation11 + $0x118] sm:$0xff]  }
 0x1c8   :  { %3101 = vmatpush.msrb.mxu1 %v4938_v62  ;;  %v2689_v55 = vadd.f32 %v2688_v29, %v943_v25  ;;  %3114 = vmatpush.msrb.mxu2 %v4983_v13  ;;  %v4975_v45 = vunpack.c.h.bf16 %v5026_v19  ;;  %v4974_v20 = vunpack.c.l.bf16 %v5026_v19  ;;  %v4963_v29 = vunpack.c.h.bf16 %v5023_v27 }
 0x1c9   :  { %3085 = vmatpush.msrb.mxu0 %v4898_v54  ;;  %v5025_v54 = vld [vmem:[#allocation11 + $0x110] sm:$0xff]  }
 0x1ca   :  { %v2675_v34 = vpop.f32.mrf.mxu3  ;;  %3102 = vmatpush.msrb.mxu1 %v4935_v15  ;;  %3115 = vmatpush.msrb.mxu2 %v4982_v14  ;;  %v4971_v21 = vunpack.c.h.bf16 %v5025_v54  ;;  %v4970_v51 = vunpack.c.l.bf16 %v5025_v54 }
 0x1cb   :  { %v2676_v35 = vadd.f32 %v2675_v34, %v2663_v33  ;;  %v2701_v31 = vpop.f32.mrf.mxu1  ;;  %v944_v34 = vperm.slane %v5446_v53, 4 }
 0x1cc   :  { %3103 = vmatpush.msrb.mxu1 %v4934_v40  ;;  %v2702_v12 = vadd.f32 %v2701_v31, %v2689_v55  ;;  %3116 = vmatpush.msrb.mxu2 %v4979_v16  ;;  %v5045_v55 = vld [vmem:[#allocation13] ss:$0 sm:$0xff] }
 0x1cd   :  { %v2863_v37 = vmax.f32 %v2676_v35, 0.0 }
 0x1ce   :  { %3104 = vmatpush.msrb.mxu1 %v4931_v44  ;;  %3117 = vmatpush.msrb.mxu2 %v4978_v18 }
 0x1cf   :  { %v2690_v39 = vpop.f32.mrf.mxu0  ;;  %3086 = vmatmul.f32.vlgmr.msrb.gmra.mxu0 %v2863_v37 }
 0x1d0   :  { %3105 = vmatpush.msrb.mxu1 %v4930_v49  ;;  %3118 = vmatpush.msrb.mxu2 %v4975_v45 }
 0x1d2   :  { %v2714_v46 = vpop.f32.mrf.mxu2  ;;  %v2677_v48 = vpop.f32.mrf.mxu3  ;;  %3119 = vmatpush.msrb.mxu2 %v4974_v20 }
 0x1d3   :  { %v2703_v50 = vpop.f32.mrf.mxu1  ;;  %v2715_v24 = vadd.f32 %v2714_v46, %v2702_v12 }
 0x1d4   :  { %3120 = vmatpush.msrb.mxu2 %v4971_v21 }
 0x1d6   :  { %3121 = vmatpush.msrb.mxu2 %v4970_v51 }
 0x1d8   :  { %3122 = vmatpush.msrb.mxu2 %v4967_v23 }
 0x1da   :  { %v2716_v52 = vpop.f32.mrf.mxu2  ;;  %3123 = vmatpush.msrb.mxu2 %v4966_v0 }
 0x1dc   :  { %3124 = vmatpush.msrb.mxu2 %v4963_v29 }
 0x1de   :  { %3125 = vmatpush.msrb.mxu2 %v4962_v61 }
 0x1e7   :  { %v2740_v56 = vpop.f32.mrf.mxu0 }
 0x1ea   :  { %v2727_v57 = vpop.f32.mrf.mxu3 }
 0x1eb   :  { %v2728_v58 = vadd.f32 %v2727_v57, %v2715_v24  ;;  %v2753_v59 = vpop.f32.mrf.mxu1 }
 0x1ed   :  { %v2741_v60 = vadd.f32 %v2740_v56, %v2728_v58 }
 0x1ef   :  { %v2742_v63 = vpop.f32.mrf.mxu0  ;;  %v2754_v30 = vadd.f32 %v2753_v59, %v2741_v60 }
 0x1f2   :  { %v2766_v41 = vpop.f32.mrf.mxu2  ;;  %v2729_v6 = vpop.f32.mrf.mxu3 }
 0x1f3   :  { %v2767_v4 = vadd.f32 %v2766_v41, %v2754_v30  ;;  %v2755_v9 = vpop.f32.mrf.mxu1 }
 0x1f5   :  { %v2864_v10 = vmax.f32 %v2767_v4, 0.0 }
 0x1f7   :  { %3106 = vmatmul.f32.vlgmr.msrb.gmra.mxu1 %v2864_v10 }
 0x1fa   :  { %v2768_v38 = vpop.f32.mrf.mxu2 }
 0x207   :  { %v2792_v22 = vpop.f32.mrf.mxu0 }
 0x20a   :  { %v2779_v26 = vpop.f32.mrf.mxu3 }
 0x20b   :  { %v2805_v47 = vpop.f32.mrf.mxu1  ;;  %v2780_v35 = vadd.f32 %v2779_v26, %v944_v34 }
 0x20d   :  { %v2793_v31 = vadd.f32 %v2792_v22, %v2780_v35 }
 0x20f   :  { %v2794_v28 = vpop.f32.mrf.mxu0  ;;  %v2806_v15 = vadd.f32 %v2805_v47, %v2793_v31 }
 0x212   :  { %v2818_v32 = vpop.f32.mrf.mxu2  ;;  %v2781_v33 = vpop.f32.mrf.mxu3 }
 0x213   :  { %v2807_v62 = vpop.f32.mrf.mxu1  ;;  %v2819_v39 = vadd.f32 %v2818_v32, %v2806_v15 }
 0x21a   :  { %v2820_v7 = vpop.f32.mrf.mxu2 }
 0x227   :  { %v2844_v37 = vpop.f32.mrf.mxu0 }
 0x22a   :  { %v2831_v40 = vpop.f32.mrf.mxu3 }
 0x22b   :  { %v2832_v42 = vadd.f32 %v2831_v40, %v2819_v39 }
 0x22c   :  { %v2857_v44 = vpop.f32.mrf.mxu1 }
 0x22d   :  { %v2845_v46 = vadd.f32 %v2844_v37, %v2832_v42 }
 0x22f   :  { %v2846_v49 = vpop.f32.mrf.mxu0  ;;  %v2858_v48 = vadd.f32 %v2857_v44, %v2845_v46 }
 0x231   :  { %v2865_v50 = vmax.f32 %v2858_v48, 0.0 }
 0x232   :  { %v2833_v52 = vpop.f32.mrf.mxu3 }
 0x233   :  { %3126 = vmatmul.f32.vlgmr.msrb.gmra.mxu2 %v2865_v50  ;;  %v3047_v56 = vpop.f32.mrf.mxu2 }
 0x234   :  { %v2859_v25 = vpop.f32.mrf.mxu1  ;;  %v3048_v53 = vadd.f32 %v5045_v55, %v3047_v56 }
 0x24a   :  { %v3067_v12 = vpop.f32.mrf.mxu3 }
 0x24b   :  { %v3068_v57 = vadd.f32 %v3067_v12, %v3048_v53 }
 0x24c   :  { %v3087_v24 = vpop.f32.mrf.mxu0 }
 0x24d   :  { %v3088_v59 = vadd.f32 %v3087_v24, %v3068_v57 }
 0x274   :  { %v3107_v58 = vpop.f32.mrf.mxu1 }
 0x275   :  { %v3108_v60 = vadd.f32 %v3107_v58, %v3088_v59 }
 0x2b6   :  { %v3127_v63 = vpop.f32.mrf.mxu2 }
 0x2b7   :  { %v3128_v1 = vadd.f32 %v3127_v63, %v3108_v60 }
 0x2b9   :  { %5046 = vtanh.f32 %v3128_v1 }
 0x2bf   :  { %v5047_v2 = vpop.eup %5046 }
 0x2c0   :  { %3131 = vst [vmem:[#allocation14] sm:$0xff] %v5047_v2 }
 0x2c1   :  { %3142 = dma.vmem_to_hbm [thread:$0]  %s3138_s6, 128, %s3140_s15, [#allocation4]  }
 0x2c2   :  { %5249 = dma.done.wait [#allocation4], 128  }
 0x2c3   :  { %5250 = vsyncadd [#allocation4], 4294967168 }
 0x2c4   :  { %3147 = vsyncpa [#allocation3], 1 }
 0x2c5   :  { %3148 = vsyncpa [#allocation6], 1 }
 0x2c6   :  { %3149 = vsyncpa [#allocation9], 1 }
 0x2c7   :  { %3150 = vsyncpa [#allocation12], 1 }
 0x2c8   :  { %3151 = vsyncpa [#allocation4], 1 }

</bundles_post_ra>
